<compile_context>
chip_gen: v5e
topology: v5e:2x2
jax: 0.10.0
libtpu: 0.0.40
codegen_flags: <defaults>
</compile_context>

<pallas_src>
import functools
import math

import jax
import jax.numpy as jnp
from jax import lax
from jax.experimental import pallas as pl
from jax.experimental.pallas import tpu as pltpu


def _round_up(v, m):
    return ((v + m - 1) // m) * m


def _sublane_multiple(dtype):
    # 8 for f32, 16 for bf16, 32 for int8/fp8 -> keeps loads/stores sublane-dense.
    itemsize = jnp.dtype(dtype).itemsize
    return max(8, 32 // max(itemsize, 1))


def _device_info():
    """(tensorcores_per_chip, physical_vmem_bytes) with conservative defaults."""
    try:
        kind = jax.devices()[0].device_kind.lower()
    except Exception:
        kind = ""
    if "v7" in kind:
        return 2, 64 * 1024 * 1024
    return 1, 128 * 1024 * 1024


def _fused_stack_kernel(x_ref, *refs, layer_dims, final_act, eps):
    """Whole Linear+LayerNorm(+ReLU) stack on one (tm, d_in_p) row tile.

    refs = [w0, pgb0, w1, pgb1, ..., o_ref]; pgb_i rows are (bias, gamma, beta).
    Invariant: padded feature lanes of the running activation are exactly zero
    (zero-padded weight columns, bias, gamma and beta keep them zero).
    """
    o_ref = refs[-1]
    param_refs = refs[:-1]
    num_layers = len(layer_dims)

    # (1, dp) f32 variance masks, one per distinct (padded, real) width pair, hoisted
    # out of the layer loop (cheap lane-iota on a single sublane, reused per layer).
    masks = {}
    for i, (_, d_out) in enumerate(layer_dims):
        dp = param_refs[2 * i].shape[1]
        if dp != d_out and (dp, d_out) not in masks:
            lane = lax.broadcasted_iota(jnp.int32, (1, dp), 1)
            masks[(dp, d_out)] = (lane < d_out).astype(jnp.float32)

    x = x_ref[...]          # native/compute dtype; padded lanes are zero
    y = None
    for i, (_, d_out) in enumerate(layer_dims):
        w_ref = param_refs[2 * i]
        pgb_ref = param_refs[2 * i + 1]
        has_act = final_act if i == num_layers - 1 else True

        # Linear on the MXU in the operand dtype; f32 accumulation.
        y = jnp.dot(x, w_ref[...], preferred_element_type=jnp.float32)
        pgb = pgb_ref[...].astype(jnp.float32)           # (3, do_p): bias/gamma/beta
        y = y + pgb[0:1, :]

        dp = y.shape[-1]
        inv_d = jnp.float32(1.0 / d_out)
        # Padded lanes of y are exactly zero -> plain sums run over real lanes only.
        mean = jnp.sum(y, axis=-1, keepdims=True) * inv_d
        centered = y - mean
        if dp != d_out:
            centered = centered * masks[(dp, d_out)]     # re-zero padded lanes
        var = jnp.sum(centered * centered, axis=-1, keepdims=True) * inv_d
        y = centered * lax.rsqrt(var + jnp.float32(eps))
        y = y * pgb[1:2, :] + pgb[2:3, :]                # padded gamma/beta are zero
        if has_act:
            y = jnp.maximum(y, 0.0)
        if i < num_layers - 1:
            x = y.astype(x_ref.dtype)

    o_ref[...] = y.astype(o_ref.dtype)


def general_multi_layer(x, params, *, final_act=True, eps=1e-5, tm=512,
                        compute_dtype=None):
    """Run the fused GeneralMultiLayer stack.

    x:      (N, d_in)
    params: list of (w, b, gamma, beta) with w of shape (d_in_i, d_out_i)
            (w already transposed relative to torch.nn.Linear.weight),
            b/gamma/beta of shape (1, d_out_i).
    compute_dtype: optional dtype (e.g. jnp.bfloat16) for weights + running
            activation; matmuls still accumulate in f32 and LayerNorm runs in f32.
    """
    n, d_in = x.shape
    assert params and params[0][0].shape[0] == d_in

    layer_dims = tuple((w.shape[0], w.shape[1]) for (w, _, _, _) in params)
    d_out = layer_dims[-1][1]
    num_layers = len(params)

    act_dtype = jnp.dtype(compute_dtype) if compute_dtype is not None else x.dtype

    # --- pad feature dims to multiples of 128 (lane-dense loads/stores); pack
    #     bias/gamma/beta into one (3, do_p) array per layer (one DMA instead of 3) ---
    d_in_p = _round_up(d_in, 128)
    d_out_p = _round_up(d_out, 128)
    packed = []
    for (w, b, g, bt), (di, do) in zip(params, layer_dims):
        di_p, do_p = _round_up(di, 128), _round_up(do, 128)
        w_p = jnp.zeros((di_p, do_p), act_dtype).at[:di, :do].set(w.astype(act_dtype))
        pgb = jnp.zeros((3, do_p), jnp.float32)
        pgb = pgb.at[0, :do].set(b.reshape(-1).astype(jnp.float32))
        pgb = pgb.at[1, :do].set(g.reshape(-1).astype(jnp.float32))
        pgb = pgb.at[2, :do].set(bt.reshape(-1).astype(jnp.float32))
        packed.append((w_p, pgb))

    # --- row tile: as big as possible (amortize ~0.35us/step); only split for
    #     parallelism on multi-TensorCore chips (v7x), aiming for >= 2 steps/core ---
    num_tc, vmem_phys = _device_info()
    sub = _sublane_multiple(act_dtype)
    tm_eff = _round_up(min(int(tm), _round_up(n, sub)), sub)
    if num_tc > 1 and n >= 2 * num_tc * sub:
        tm_eff = min(tm_eff, _round_up(pl.cdiv(n, 2 * num_tc), sub))
    n_p = _round_up(n, tm_eff)
    grid = (n_p // tm_eff,)

    x_p = jnp.zeros((n_p, d_in_p), act_dtype).at[:n, :d_in].set(x.astype(act_dtype))

    # --- VMEM budget: params single-buffered + double-buffered in/out tiles + f32
    #     intermediates, with headroom; capped below physical VMEM of the chip ---
    act_isz = jnp.dtype(act_dtype).itemsize
    out_isz = jnp.dtype(x.dtype).itemsize
    param_bytes = sum(int(w_p.size) * w_p.dtype.itemsize + 8 * int(pgb.shape[1]) * 4
                      for (w_p, pgb) in packed)          # pgb sublane-padded to 8 rows
    io_bytes = 2 * tm_eff * d_in_p * act_isz + 2 * tm_eff * d_out_p * out_isz
    max_dp = max(_round_up(do, 128) for (_, do) in layer_dims)
    interm_bytes = 6 * tm_eff * max_dp * 4
    needed = param_bytes + io_bytes + interm_bytes
    vmem_limit = int(min(max(needed * 3 // 2 + (4 << 20), 16 << 20), vmem_phys * 3 // 4))
    # TODO(synk): if param_bytes approaches the cap (deep stacks / large dim_inner,
    # especially on v7x's 64 MiB), switch to K/N-tiling each layer (emit_pipeline over
    # the hidden dim) instead of keeping all weights resident.

    flops = 2 * n_p * sum(_round_up(di, 128) * _round_up(do, 128)
                          for (di, do) in layer_dims)
    bytes_accessed = int(x_p.size) * act_isz + param_bytes + n_p * d_out_p * out_isz
    cost = pl.CostEstimate(flops=int(flops),
                           transcendentals=int(n_p * num_layers),
                           bytes_accessed=int(bytes_accessed))

    kernel = functools.partial(
        _fused_stack_kernel, layer_dims=layer_dims, final_act=final_act, eps=eps
    )

    def _make_call(single_buffer_params):
        def _const_spec(shape):
            if single_buffer_params:
                # Constant index map -> fetched once; 1 buffer halves resident VMEM.
                return pl.BlockSpec(shape, lambda i: (0, 0),
                                    pipeline_mode=pl.Buffered(1))
            return pl.BlockSpec(shape, lambda i: (0, 0))

        in_specs = [pl.BlockSpec((tm_eff, d_in_p), lambda i: (i, 0))]
        for (w_p, pgb) in packed:
            in_specs.append(_const_spec(w_p.shape))
            in_specs.append(_const_spec(pgb.shape))

        return pl.pallas_call(
            kernel,
            out_shape=jax.ShapeDtypeStruct((n_p, d_out_p), x.dtype),
            grid_spec=pltpu.PrefetchScalarGridSpec(
                num_scalar_prefetch=0,
                grid=grid,
                in_specs=in_specs,
                out_specs=pl.BlockSpec((tm_eff, d_out_p), lambda i: (i, 0)),
            ),
            compiler_params=pltpu.CompilerParams(
                dimension_semantics=("parallel",),
                vmem_limit_bytes=vmem_limit,
            ),
            cost_estimate=cost,
        )

    flat_params = [p for pair in packed for p in pair]
    try:
        out_p = _make_call(True)(x_p, *flat_params)
    except Exception:
        # Fallback for environments where BlockSpec.pipeline_mode / Buffered(1) is
        # unavailable: identical math, just double-buffered constant params.
        out_p = _make_call(False)(x_p, *flat_params)

    return out_p[:n, :d_out]


def init_general_multi_layer_params(key, num_layers, dim_in, dim_out, dim_inner=None):
    """Deterministic parameter init mimicking torch.nn.Linear / nn.LayerNorm defaults."""
    dim_inner = dim_in if dim_inner is None else dim_inner
    params = []
    for i in range(num_layers):
        d_in = dim_in if i == 0 else dim_inner
        d_out = dim_out if i == num_layers - 1 else dim_inner
        key, kw, kb = jax.random.split(key, 3)
        bound = 1.0 / math.sqrt(d_in)
        w = jax.random.uniform(kw, (d_in, d_out), jnp.float32, -bound, bound)
        b = jax.random.uniform(kb, (1, d_out), jnp.float32, -bound, bound)
        gamma = jnp.ones((1, d_out), jnp.float32)
        beta = jnp.zeros((1, d_out), jnp.float32)
        params.append((w, b, gamma, beta))
    return params


def _reference(x, params, *, final_act=True, eps=1e-5):
    """Pure-JAX reference of the PyTorch forward for verification."""
    num_layers = len(params)
    for i, (w, b, gamma, beta) in enumerate(params):
        has_act = final_act if i == num_layers - 1 else True
        y = x @ w + b
        mean = jnp.mean(y, axis=-1, keepdims=True)
        var = jnp.mean((y - mean) ** 2, axis=-1, keepdims=True)
        y = (y - mean) / jnp.sqrt(var + eps)
        y = y * gamma + beta
        if has_act:
            y = jnp.maximum(y, 0.0)
        x = y
    return x


if __name__ == "__main__":
    # Small config consistent with the module: num_layers=2, dim_in=16, dim_out=32,
    # dim_inner defaults to dim_in (=16). Input batch of 64 rows of dim_in features.
    num_layers, dim_in, dim_out = 2, 16, 32
    n_rows = 64

    key = jax.random.PRNGKey(0)
    key, kx = jax.random.split(key)
    x = jax.random.normal(kx, (n_rows, dim_in), jnp.float32)
    params = init_general_multi_layer_params(key, num_layers, dim_in, dim_out)

    ref = _reference(x, params, final_act=True)

    # f32 path: bit-for-bit-comparable against the pure-JAX reference.
    out = jax.block_until_ready(general_multi_layer(x, params, final_act=True))
    assert out.shape == (n_rows, dim_out)
    assert jnp.allclose(out, ref, atol=1e-5, rtol=1e-5), "Pallas kernel mismatch vs reference"

    # bf16 compute path (MXU-native operands, f32 accumulation / LayerNorm stats).
    out_bf16 = jax.block_until_ready(
        general_multi_layer(x, params, final_act=True, compute_dtype=jnp.bfloat16))
    assert out_bf16.shape == (n_rows, dim_out)
    assert bool(jnp.all(jnp.isfinite(out_bf16)))
    assert float(jnp.max(jnp.abs(out_bf16 - ref))) < 0.25, "bf16 path drifted too far"

    print("KERNEL_OK")
</pallas_src>

<mosaic_0001>
module attributes {stable_mosaic.version = 11 : i64} {
  func.func @_fused_stack_kernel(%arg0: i32, %arg1: memref<64x128xf32, #tpu.memory_space<vmem>>, %arg2: memref<128x128xf32, #tpu.memory_space<vmem>>, %arg3: memref<3x128xf32, #tpu.memory_space<vmem>>, %arg4: memref<128x128xf32, #tpu.memory_space<vmem>>, %arg5: memref<3x128xf32, #tpu.memory_space<vmem>>, %arg6: memref<64x128xf32, #tpu.memory_space<vmem>>) attributes {dimension_semantics = [#tpu.dimension_semantics<parallel>], iteration_bounds = array<i64: 1>, scalar_prefetch = 0 : i64, scratch_operands = 0 : i64, tpu.core_type = #tpu.core_type<tc>, window_params = [{transform_indices = @transform_0, window_bounds = array<i64: 64, 128>}, {pipeline_mode = #tpu.pipeline_mode<synchronous>, transform_indices = @transform_1, window_bounds = array<i64: 128, 128>}, {pipeline_mode = #tpu.pipeline_mode<synchronous>, transform_indices = @transform_2, window_bounds = array<i64: 3, 128>}, {pipeline_mode = #tpu.pipeline_mode<synchronous>, transform_indices = @transform_3, window_bounds = array<i64: 128, 128>}, {pipeline_mode = #tpu.pipeline_mode<synchronous>, transform_indices = @transform_4, window_bounds = array<i64: 3, 128>}, {transform_indices = @transform_5, window_bounds = array<i64: 64, 128>}]} {
    %0 = tpu.iota {dimensions = array<i32: 1>} : vector<1x128xi32>
    %c16_i32 = arith.constant 16 : i32
    %1 = vector.broadcast %c16_i32 : i32 to vector<1x128xi32>
    %2 = arith.cmpi slt, %0, %1 : vector<1x128xi32>
    %3 = arith.extui %2 : vector<1x128xi1> to vector<1x128xi32>
    %4 = arith.sitofp %3 : vector<1x128xi32> to vector<1x128xf32>
    %5 = tpu.iota {dimensions = array<i32: 1>} : vector<1x128xi32>
    %c32_i32 = arith.constant 32 : i32
    %6 = vector.broadcast %c32_i32 : i32 to vector<1x128xi32>
    %7 = arith.cmpi slt, %5, %6 : vector<1x128xi32>
    %8 = arith.extui %7 : vector<1x128xi1> to vector<1x128xi32>
    %9 = arith.sitofp %8 : vector<1x128xi32> to vector<1x128xf32>
    %c0 = arith.constant 0 : index
    %c0_0 = arith.constant 0 : index
    %10 = vector.load %arg1[%c0, %c0_0] : memref<64x128xf32, #tpu.memory_space<vmem>>, vector<64x128xf32>
    %c0_1 = arith.constant 0 : index
    %c0_2 = arith.constant 0 : index
    %11 = vector.load %arg2[%c0_1, %c0_2] : memref<128x128xf32, #tpu.memory_space<vmem>>, vector<128x128xf32>
    %cst = arith.constant dense<0.000000e+00> : vector<64x128xf32>
    %12 = tpu.matmul %10, %11, %cst {dimension_numbers = #tpu.dot_dimension_numbers<[1], [0], [0], [1], [0, 0, 1, 1], [], []>} : vector<64x128xf32>, vector<128x128xf32>, vector<64x128xf32> -> vector<64x128xf32>
    %c0_3 = arith.constant 0 : index
    %c0_4 = arith.constant 0 : index
    %13 = vector.load %arg3[%c0_3, %c0_4] : memref<3x128xf32, #tpu.memory_space<vmem>>, vector<3x128xf32>
    %14 = vector.extract_strided_slice %13 {offsets = [0, 0], sizes = [1, 128], strides = [1, 1]} : vector<3x128xf32> to vector<1x128xf32>
    %15 = vector.broadcast %14 : vector<1x128xf32> to vector<64x128xf32>
    %16 = arith.addf %12, %15 : vector<64x128xf32>
    %cst_5 = arith.constant dense<0.000000e+00> : vector<64xf32>
    %17 = vector.multi_reduction <add>, %16, %cst_5 [1] : vector<64x128xf32> to vector<64xf32>
    %18 = vector.shape_cast %17 : vector<64xf32> to vector<64x1xf32>
    %cst_6 = arith.constant 6.250000e-02 : f32
    %19 = vector.broadcast %cst_6 : f32 to vector<64x1xf32>
    %20 = arith.mulf %18, %19 : vector<64x1xf32>
    %21 = vector.broadcast %20 : vector<64x1xf32> to vector<64x128xf32>
    %22 = arith.subf %16, %21 : vector<64x128xf32>
    %23 = vector.broadcast %4 : vector<1x128xf32> to vector<64x128xf32>
    %24 = arith.mulf %22, %23 : vector<64x128xf32>
    %25 = arith.mulf %24, %24 : vector<64x128xf32>
    %cst_7 = arith.constant dense<0.000000e+00> : vector<64xf32>
    %26 = vector.multi_reduction <add>, %25, %cst_7 [1] : vector<64x128xf32> to vector<64xf32>
    %27 = vector.shape_cast %26 : vector<64xf32> to vector<64x1xf32>
    %cst_8 = arith.constant 6.250000e-02 : f32
    %28 = vector.broadcast %cst_8 : f32 to vector<64x1xf32>
    %29 = arith.mulf %27, %28 : vector<64x1xf32>
    %cst_9 = arith.constant 9.99999974E-6 : f32
    %30 = vector.broadcast %cst_9 : f32 to vector<64x1xf32>
    %31 = arith.addf %29, %30 : vector<64x1xf32>
    %32 = math.rsqrt %31 : vector<64x1xf32>
    %33 = vector.broadcast %32 : vector<64x1xf32> to vector<64x128xf32>
    %34 = arith.mulf %24, %33 : vector<64x128xf32>
    %35 = vector.extract_strided_slice %13 {offsets = [1, 0], sizes = [1, 128], strides = [1, 1]} : vector<3x128xf32> to vector<1x128xf32>
    %36 = vector.broadcast %35 : vector<1x128xf32> to vector<64x128xf32>
    %37 = arith.mulf %34, %36 : vector<64x128xf32>
    %38 = vector.extract_strided_slice %13 {offsets = [2, 0], sizes = [1, 128], strides = [1, 1]} : vector<3x128xf32> to vector<1x128xf32>
    %39 = vector.broadcast %38 : vector<1x128xf32> to vector<64x128xf32>
    %40 = arith.addf %37, %39 : vector<64x128xf32>
    %cst_10 = arith.constant 0.000000e+00 : f32
    %41 = vector.broadcast %cst_10 : f32 to vector<64x128xf32>
    %42 = arith.maximumf %40, %41 : vector<64x128xf32>
    %c0_11 = arith.constant 0 : index
    %c0_12 = arith.constant 0 : index
    %43 = vector.load %arg4[%c0_11, %c0_12] : memref<128x128xf32, #tpu.memory_space<vmem>>, vector<128x128xf32>
    %cst_13 = arith.constant dense<0.000000e+00> : vector<64x128xf32>
    %44 = tpu.matmul %42, %43, %cst_13 {dimension_numbers = #tpu.dot_dimension_numbers<[1], [0], [0], [1], [0, 0, 1, 1], [], []>} : vector<64x128xf32>, vector<128x128xf32>, vector<64x128xf32> -> vector<64x128xf32>
    %c0_14 = arith.constant 0 : index
    %c0_15 = arith.constant 0 : index
    %45 = vector.load %arg5[%c0_14, %c0_15] : memref<3x128xf32, #tpu.memory_space<vmem>>, vector<3x128xf32>
    %46 = vector.extract_strided_slice %45 {offsets = [0, 0], sizes = [1, 128], strides = [1, 1]} : vector<3x128xf32> to vector<1x128xf32>
    %47 = vector.broadcast %46 : vector<1x128xf32> to vector<64x128xf32>
    %48 = arith.addf %44, %47 : vector<64x128xf32>
    %cst_16 = arith.constant dense<0.000000e+00> : vector<64xf32>
    %49 = vector.multi_reduction <add>, %48, %cst_16 [1] : vector<64x128xf32> to vector<64xf32>
    %50 = vector.shape_cast %49 : vector<64xf32> to vector<64x1xf32>
    %cst_17 = arith.constant 3.125000e-02 : f32
    %51 = vector.broadcast %cst_17 : f32 to vector<64x1xf32>
    %52 = arith.mulf %50, %51 : vector<64x1xf32>
    %53 = vector.broadcast %52 : vector<64x1xf32> to vector<64x128xf32>
    %54 = arith.subf %48, %53 : vector<64x128xf32>
    %55 = vector.broadcast %9 : vector<1x128xf32> to vector<64x128xf32>
    %56 = arith.mulf %54, %55 : vector<64x128xf32>
    %57 = arith.mulf %56, %56 : vector<64x128xf32>
    %cst_18 = arith.constant dense<0.000000e+00> : vector<64xf32>
    %58 = vector.multi_reduction <add>, %57, %cst_18 [1] : vector<64x128xf32> to vector<64xf32>
    %59 = vector.shape_cast %58 : vector<64xf32> to vector<64x1xf32>
    %cst_19 = arith.constant 3.125000e-02 : f32
    %60 = vector.broadcast %cst_19 : f32 to vector<64x1xf32>
    %61 = arith.mulf %59, %60 : vector<64x1xf32>
    %cst_20 = arith.constant 9.99999974E-6 : f32
    %62 = vector.broadcast %cst_20 : f32 to vector<64x1xf32>
    %63 = arith.addf %61, %62 : vector<64x1xf32>
    %64 = math.rsqrt %63 : vector<64x1xf32>
    %65 = vector.broadcast %64 : vector<64x1xf32> to vector<64x128xf32>
    %66 = arith.mulf %56, %65 : vector<64x128xf32>
    %67 = vector.extract_strided_slice %45 {offsets = [1, 0], sizes = [1, 128], strides = [1, 1]} : vector<3x128xf32> to vector<1x128xf32>
    %68 = vector.broadcast %67 : vector<1x128xf32> to vector<64x128xf32>
    %69 = arith.mulf %66, %68 : vector<64x128xf32>
    %70 = vector.extract_strided_slice %45 {offsets = [2, 0], sizes = [1, 128], strides = [1, 1]} : vector<3x128xf32> to vector<1x128xf32>
    %71 = vector.broadcast %70 : vector<1x128xf32> to vector<64x128xf32>
    %72 = arith.addf %69, %71 : vector<64x128xf32>
    %cst_21 = arith.constant 0.000000e+00 : f32
    %73 = vector.broadcast %cst_21 : f32 to vector<64x128xf32>
    %74 = arith.maximumf %72, %73 : vector<64x128xf32>
    %c0_22 = arith.constant 0 : index
    %c0_23 = arith.constant 0 : index
    %75 = vector.load %arg6[%c0_22, %c0_23] : memref<64x128xf32, #tpu.memory_space<vmem>>, vector<64x128xf32>
    tpu.vector_store %arg6[%c0_22, %c0_23], %74 {strides = array<i32>} : memref<64x128xf32, #tpu.memory_space<vmem>>, vector<64x128xf32>,
    return
  }
  func.func @transform_0(%arg0: i32) -> (i32, i32) {
    %c0_i32 = arith.constant 0 : i32
    %c0_i32_0 = arith.constant 0 : i32
    return %arg0, %c0_i32 : i32, i32
  }
  func.func @transform_1(%arg0: i32) -> (i32, i32) {
    %c0_i32 = arith.constant 0 : i32
    %c0_i32_0 = arith.constant 0 : i32
    %c0_i32_1 = arith.constant 0 : i32
    return %c0_i32, %c0_i32_0 : i32, i32
  }
  func.func @transform_2(%arg0: i32) -> (i32, i32) {
    %c0_i32 = arith.constant 0 : i32
    %c0_i32_0 = arith.constant 0 : i32
    %c0_i32_1 = arith.constant 0 : i32
    return %c0_i32, %c0_i32_0 : i32, i32
  }
  func.func @transform_3(%arg0: i32) -> (i32, i32) {
    %c0_i32 = arith.constant 0 : i32
    %c0_i32_0 = arith.constant 0 : i32
    %c0_i32_1 = arith.constant 0 : i32
    return %c0_i32, %c0_i32_0 : i32, i32
  }
  func.func @transform_4(%arg0: i32) -> (i32, i32) {
    %c0_i32 = arith.constant 0 : i32
    %c0_i32_0 = arith.constant 0 : i32
    %c0_i32_1 = arith.constant 0 : i32
    return %c0_i32, %c0_i32_0 : i32, i32
  }
  func.func @transform_5(%arg0: i32) -> (i32, i32) {
    %c0_i32 = arith.constant 0 : i32
    %c0_i32_0 = arith.constant 0 : i32
    return %arg0, %c0_i32 : i32, i32
  }
}

module attributes {stable_mosaic.version = 11 : i64} {
  func.func @_fused_stack_kernel(%arg0: i32, %arg1: memref<64x128xf32, #tpu.memory_space<vmem>>, %arg2: memref<128x128xf32, #tpu.memory_space<vmem>>, %arg3: memref<3x128xf32, #tpu.memory_space<vmem>>, %arg4: memref<128x128xf32, #tpu.memory_space<vmem>>, %arg5: memref<3x128xf32, #tpu.memory_space<vmem>>, %arg6: memref<64x128xf32, #tpu.memory_space<vmem>>) attributes {dimension_semantics = [#tpu.dimension_semantics<parallel>], iteration_bounds = array<i64: 1>, scalar_prefetch = 0 : i64, scratch_operands = 0 : i64, tpu.core_type = #tpu.core_type<tc>, window_params = [{transform_indices = @transform_0, window_bounds = array<i64: 64, 128>}, {pipeline_mode = #tpu.pipeline_mode<synchronous>, transform_indices = @transform_1, window_bounds = array<i64: 128, 128>}, {pipeline_mode = #tpu.pipeline_mode<synchronous>, transform_indices = @transform_2, window_bounds = array<i64: 3, 128>}, {pipeline_mode = #tpu.pipeline_mode<synchronous>, transform_indices = @transform_3, window_bounds = array<i64: 128, 128>}, {pipeline_mode = #tpu.pipeline_mode<synchronous>, transform_indices = @transform_4, window_bounds = array<i64: 3, 128>}, {transform_indices = @transform_5, window_bounds = array<i64: 64, 128>}]} {
    %0 = tpu.iota {dimensions = array<i32: 1>} : vector<1x128xi32>
    %c16_i32 = arith.constant 16 : i32
    %1 = vector.broadcast %c16_i32 : i32 to vector<1x128xi32>
    %2 = arith.cmpi slt, %0, %1 : vector<1x128xi32>
    %3 = arith.extui %2 : vector<1x128xi1> to vector<1x128xi32>
    %4 = arith.sitofp %3 : vector<1x128xi32> to vector<1x128xf32>
    %5 = tpu.iota {dimensions = array<i32: 1>} : vector<1x128xi32>
    %c32_i32 = arith.constant 32 : i32
    %6 = vector.broadcast %c32_i32 : i32 to vector<1x128xi32>
    %7 = arith.cmpi slt, %5, %6 : vector<1x128xi32>
    %8 = arith.extui %7 : vector<1x128xi1> to vector<1x128xi32>
    %9 = arith.sitofp %8 : vector<1x128xi32> to vector<1x128xf32>
    %c0 = arith.constant 0 : index
    %c0_0 = arith.constant 0 : index
    %10 = vector.load %arg1[%c0, %c0_0] : memref<64x128xf32, #tpu.memory_space<vmem>>, vector<64x128xf32>
    %c0_1 = arith.constant 0 : index
    %c0_2 = arith.constant 0 : index
    %11 = vector.load %arg2[%c0_1, %c0_2] : memref<128x128xf32, #tpu.memory_space<vmem>>, vector<128x128xf32>
    %cst = arith.constant dense<0.000000e+00> : vector<64x128xf32>
    %12 = tpu.matmul %10, %11, %cst {dimension_numbers = #tpu.dot_dimension_numbers<[1], [0], [0], [1], [0, 0, 1, 1], [], []>} : vector<64x128xf32>, vector<128x128xf32>, vector<64x128xf32> -> vector<64x128xf32>
    %c0_3 = arith.constant 0 : index
    %c0_4 = arith.constant 0 : index
    %13 = vector.load %arg3[%c0_3, %c0_4] : memref<3x128xf32, #tpu.memory_space<vmem>>, vector<3x128xf32>
    %14 = vector.extract_strided_slice %13 {offsets = [0, 0], sizes = [1, 128], strides = [1, 1]} : vector<3x128xf32> to vector<1x128xf32>
    %15 = vector.broadcast %14 : vector<1x128xf32> to vector<64x128xf32>
    %16 = arith.addf %12, %15 : vector<64x128xf32>
    %cst_5 = arith.constant dense<0.000000e+00> : vector<64xf32>
    %17 = vector.multi_reduction <add>, %16, %cst_5 [1] : vector<64x128xf32> to vector<64xf32>
    %18 = vector.shape_cast %17 : vector<64xf32> to vector<64x1xf32>
    %cst_6 = arith.constant 6.250000e-02 : f32
    %19 = vector.broadcast %cst_6 : f32 to vector<64x1xf32>
    %20 = arith.mulf %18, %19 : vector<64x1xf32>
    %21 = vector.broadcast %20 : vector<64x1xf32> to vector<64x128xf32>
    %22 = arith.subf %16, %21 : vector<64x128xf32>
    %23 = vector.broadcast %4 : vector<1x128xf32> to vector<64x128xf32>
    %24 = arith.mulf %22, %23 : vector<64x128xf32>
    %25 = arith.mulf %24, %24 : vector<64x128xf32>
    %cst_7 = arith.constant dense<0.000000e+00> : vector<64xf32>
    %26 = vector.multi_reduction <add>, %25, %cst_7 [1] : vector<64x128xf32> to vector<64xf32>
    %27 = vector.shape_cast %26 : vector<64xf32> to vector<64x1xf32>
    %cst_8 = arith.constant 6.250000e-02 : f32
    %28 = vector.broadcast %cst_8 : f32 to vector<64x1xf32>
    %29 = arith.mulf %27, %28 : vector<64x1xf32>
    %cst_9 = arith.constant 9.99999974E-6 : f32
    %30 = vector.broadcast %cst_9 : f32 to vector<64x1xf32>
    %31 = arith.addf %29, %30 : vector<64x1xf32>
    %32 = math.rsqrt %31 : vector<64x1xf32>
    %33 = vector.broadcast %32 : vector<64x1xf32> to vector<64x128xf32>
    %34 = arith.mulf %24, %33 : vector<64x128xf32>
    %35 = vector.extract_strided_slice %13 {offsets = [1, 0], sizes = [1, 128], strides = [1, 1]} : vector<3x128xf32> to vector<1x128xf32>
    %36 = vector.broadcast %35 : vector<1x128xf32> to vector<64x128xf32>
    %37 = arith.mulf %34, %36 : vector<64x128xf32>
    %38 = vector.extract_strided_slice %13 {offsets = [2, 0], sizes = [1, 128], strides = [1, 1]} : vector<3x128xf32> to vector<1x128xf32>
    %39 = vector.broadcast %38 : vector<1x128xf32> to vector<64x128xf32>
    %40 = arith.addf %37, %39 : vector<64x128xf32>
    %cst_10 = arith.constant 0.000000e+00 : f32
    %41 = vector.broadcast %cst_10 : f32 to vector<64x128xf32>
    %42 = arith.maximumf %40, %41 : vector<64x128xf32>
    %c0_11 = arith.constant 0 : index
    %c0_12 = arith.constant 0 : index
    %43 = vector.load %arg4[%c0_11, %c0_12] : memref<128x128xf32, #tpu.memory_space<vmem>>, vector<128x128xf32>
    %cst_13 = arith.constant dense<0.000000e+00> : vector<64x128xf32>
    %44 = tpu.matmul %42, %43, %cst_13 {dimension_numbers = #tpu.dot_dimension_numbers<[1], [0], [0], [1], [0, 0, 1, 1], [], []>} : vector<64x128xf32>, vector<128x128xf32>, vector<64x128xf32> -> vector<64x128xf32>
    %c0_14 = arith.constant 0 : index
    %c0_15 = arith.constant 0 : index
    %45 = vector.load %arg5[%c0_14, %c0_15] : memref<3x128xf32, #tpu.memory_space<vmem>>, vector<3x128xf32>
    %46 = vector.extract_strided_slice %45 {offsets = [0, 0], sizes = [1, 128], strides = [1, 1]} : vector<3x128xf32> to vector<1x128xf32>
    %47 = vector.broadcast %46 : vector<1x128xf32> to vector<64x128xf32>
    %48 = arith.addf %44, %47 : vector<64x128xf32>
    %cst_16 = arith.constant dense<0.000000e+00> : vector<64xf32>
    %49 = vector.multi_reduction <add>, %48, %cst_16 [1] : vector<64x128xf32> to vector<64xf32>
    %50 = vector.shape_cast %49 : vector<64xf32> to vector<64x1xf32>
    %cst_17 = arith.constant 3.125000e-02 : f32
    %51 = vector.broadcast %cst_17 : f32 to vector<64x1xf32>
    %52 = arith.mulf %50, %51 : vector<64x1xf32>
    %53 = vector.broadcast %52 : vector<64x1xf32> to vector<64x128xf32>
    %54 = arith.subf %48, %53 : vector<64x128xf32>
    %55 = vector.broadcast %9 : vector<1x128xf32> to vector<64x128xf32>
    %56 = arith.mulf %54, %55 : vector<64x128xf32>
    %57 = arith.mulf %56, %56 : vector<64x128xf32>
    %cst_18 = arith.constant dense<0.000000e+00> : vector<64xf32>
    %58 = vector.multi_reduction <add>, %57, %cst_18 [1] : vector<64x128xf32> to vector<64xf32>
    %59 = vector.shape_cast %58 : vector<64xf32> to vector<64x1xf32>
    %cst_19 = arith.constant 3.125000e-02 : f32
    %60 = vector.broadcast %cst_19 : f32 to vector<64x1xf32>
    %61 = arith.mulf %59, %60 : vector<64x1xf32>
    %cst_20 = arith.constant 9.99999974E-6 : f32
    %62 = vector.broadcast %cst_20 : f32 to vector<64x1xf32>
    %63 = arith.addf %61, %62 : vector<64x1xf32>
    %64 = math.rsqrt %63 : vector<64x1xf32>
    %65 = vector.broadcast %64 : vector<64x1xf32> to vector<64x128xf32>
    %66 = arith.mulf %56, %65 : vector<64x128xf32>
    %67 = vector.extract_strided_slice %45 {offsets = [1, 0], sizes = [1, 128], strides = [1, 1]} : vector<3x128xf32> to vector<1x128xf32>
    %68 = vector.broadcast %67 : vector<1x128xf32> to vector<64x128xf32>
    %69 = arith.mulf %66, %68 : vector<64x128xf32>
    %70 = vector.extract_strided_slice %45 {offsets = [2, 0], sizes = [1, 128], strides = [1, 1]} : vector<3x128xf32> to vector<1x128xf32>
    %71 = vector.broadcast %70 : vector<1x128xf32> to vector<64x128xf32>
    %72 = arith.addf %69, %71 : vector<64x128xf32>
    %cst_21 = arith.constant 0.000000e+00 : f32
    %73 = vector.broadcast %cst_21 : f32 to vector<64x128xf32>
    %74 = arith.maximumf %72, %73 : vector<64x128xf32>
    %c0_22 = arith.constant 0 : index
    %c0_23 = arith.constant 0 : index
    %75 = vector.load %arg6[%c0_22, %c0_23] : memref<64x128xf32, #tpu.memory_space<vmem>>, vector<64x128xf32>
    tpu.vector_store %arg6[%c0_22, %c0_23], %74 {strides = array<i32>} : memref<64x128xf32, #tpu.memory_space<vmem>>, vector<64x128xf32>,
    return
  }
  func.func @transform_0(%arg0: i32) -> (i32, i32) {
    %c0_i32 = arith.constant 0 : i32
    %c0_i32_0 = arith.constant 0 : i32
    return %arg0, %c0_i32 : i32, i32
  }
  func.func @transform_1(%arg0: i32) -> (i32, i32) {
    %c0_i32 = arith.constant 0 : i32
    %c0_i32_0 = arith.constant 0 : i32
    %c0_i32_1 = arith.constant 0 : i32
    return %c0_i32, %c0_i32_0 : i32, i32
  }
  func.func @transform_2(%arg0: i32) -> (i32, i32) {
    %c0_i32 = arith.constant 0 : i32
    %c0_i32_0 = arith.constant 0 : i32
    %c0_i32_1 = arith.constant 0 : i32
    return %c0_i32, %c0_i32_0 : i32, i32
  }
  func.func @transform_3(%arg0: i32) -> (i32, i32) {
    %c0_i32 = arith.constant 0 : i32
    %c0_i32_0 = arith.constant 0 : i32
    %c0_i32_1 = arith.constant 0 : i32
    return %c0_i32, %c0_i32_0 : i32, i32
  }
  func.func @transform_4(%arg0: i32) -> (i32, i32) {
    %c0_i32 = arith.constant 0 : i32
    %c0_i32_0 = arith.constant 0 : i32
    %c0_i32_1 = arith.constant 0 : i32
    return %c0_i32, %c0_i32_0 : i32, i32
  }
  func.func @transform_5(%arg0: i32) -> (i32, i32) {
    %c0_i32 = arith.constant 0 : i32
    %c0_i32_0 = arith.constant 0 : i32
    return %arg0, %c0_i32 : i32, i32
  }
}

</mosaic_0001>

<bundles_post_ra>
// kernel: tpu_custom_call.1
= control target key start
LH: loop header
LB: loop body
LE: loop exit
PB: predicated region body
PF: predicated region fallthrough
CT: control target
= control target key end

     0   :  { %10 = vsyncpa [#allocation3], 0  ;;  %s1136_s0 = inlined_call_operand.hbm [shape: f32[64,128], index: 0, kind: input, shape index: {}]   ;;  %s1137_s1 = inlined_call_operand.hbm [shape: f32[128,128], index: 1, kind: input, shape index: {}]   ;;  %s1138_s2 = inlined_call_operand.hbm [shape: f32[3,128], index: 2, kind: input, shape index: {}]   ;;  %s1139_s3 = inlined_call_operand.hbm [shape: f32[128,128], index: 3, kind: input, shape index: {}]   ;;  %s1140_s4 = inlined_call_operand.hbm [shape: f32[3,128], index: 4, kind: input, shape index: {}]   ;;  %s1141_s5 = inlined_call_operand.hbm [shape: f32[64,128], index: 5, kind: output, shape index: {}]  }
   0x1   :  { %11 = vsyncpa [#allocation6], 0 }
   0x2   :  { %12 = vsyncpa [#allocation9], 0 }
   0x3   :  { %13 = vsyncpa [#allocation4], 0  ;;  %s31_s20 = sshll.u32 %s1137_s1, 4  ;;  %s873_s21 = smov [#allocation5]   ;;  %s32_s20 = int_to_ptr.hbm [resolvable:$true] %s31_s20 }
   0x4   :  { %s33_s22 = sshll.u32 %s873_s21, 4  ;;  %s55_s25 = sshll.u32 %s1139_s3, 4  ;;  %s34_s22 = int_to_ptr.vmem [resolvable:$true] %s33_s22  ;;  %s56_s25 = int_to_ptr.hbm [resolvable:$true] %s55_s25 }
   0x5   :  { %s874_s26 = smov 128   ;;  %s875_s27 = smov 8  }
   0x6   :  { %39 = dma.hbm_to_vmem [thread:$0]  %s32_s20, 2048, %s34_s22, [#allocation6], %s874_s26, %s874_s26, %s875_s27  }
   0x7   :  { %s876_s28 = smov [#allocation8]   ;;  %s18_s1 = sshll.u32 %s1136_s0, 4  ;;  %s19_s1 = int_to_ptr.hbm [resolvable:$true] %s18_s1 }
   0x8   :  { %s57_s29 = sshll.u32 %s876_s28, 4  ;;  %s45_s8 = sshll.u32 %s1138_s2, 4  ;;  %s58_s29 = int_to_ptr.vmem [resolvable:$true] %s57_s29  ;;  %s46_s8 = int_to_ptr.hbm [resolvable:$true] %s45_s8 }
   0x9   :  { %63 = dma.hbm_to_vmem [thread:$0]  %s56_s25, 2048, %s58_s29, [#allocation9], %s874_s26, %s874_s26, %s875_s27  }
   0xa   :  { %s877_s9 = smov [#allocation2]   ;;  %s878_s11 = smov [#allocation7]  }
   0xb   :  { %s20_s10 = sshll.u32 %s877_s9, 4  ;;  %s47_s0 = sshll.u32 %s878_s11, 4  ;;  %s21_s10 = int_to_ptr.vmem [resolvable:$true] %s20_s10  ;;  %s48_s0 = int_to_ptr.vmem [resolvable:$true] %s47_s0 }
   0xc   :  { %26 = dma.hbm_to_vmem [thread:$0]  %s19_s1, 1024, %s21_s10, [#allocation3], %s874_s26, %s874_s26, %s875_s27  }
   0xd   :  { %s69_s14 = sshll.u32 %s1140_s4, 4  ;;  %s879_s15 = smov [#allocation10]   ;;  %s70_s14 = int_to_ptr.hbm [resolvable:$true] %s69_s14 }
   0xe   :  { %50 = dma.hbm_to_vmem [thread:$0]  %s46_s8, 64, %s48_s0, [#allocation6]  }
   0xf   :  { %s71_s16 = sshll.u32 %s879_s15, 4  ;;  %s72_s16 = int_to_ptr.vmem [resolvable:$true] %s71_s16 }
  0x10   :  { %74 = dma.hbm_to_vmem [thread:$0]  %s70_s14, 64, %s72_s16, [#allocation9]  }
  0x11   :  { %865 = dma.done.wait [#allocation3], 1024  }
  0x12   :  { %866 = vsyncadd [#allocation3], 4294966272 }
  0x13   :  { %867 = dma.done.wait [#allocation6], 2112  }
  0x14   :  { %868 = vsyncadd [#allocation6], 4294965184 }
  0x15   :  { %869 = dma.done.wait [#allocation9], 2112  }
  0x16   :  { %870 = vsyncadd [#allocation9], 4294965184  ;;  %v126_v0 = vld [vmem:[#allocation5 + $0x78] sm:$0xff]  ;;  %v125_v1 = vld [vmem:[#allocation5 + $0x70] sm:$0xff]  ;;  %v95_v42 = vlaneseq  ;;  %v880_v46 = vmov 0.0   ;;  %s881_s2 = smov [#allocation11]  }
  0x17   :  { %648 = vmatpush.msra.mxu2 %v126_v0  ;;  %129 = vmatpush.msra.mxu0 %v126_v0  ;;  %v124_v2 = vld [vmem:[#allocation5 + $0x68] sm:$0xff]  ;;  %v123_v3 = vld [vmem:[#allocation5 + $0x60] sm:$0xff]  ;;  %v122_v4 = vld [vmem:[#allocation5 + $0x58] sm:$0xff]  ;;  %s629_s4 = sshll.u32 %s881_s2, 4  ;;  %s631_s19 = sshll.u32 %s1141_s5, 4  ;;  %s630_s4 = int_to_ptr.vmem [resolvable:$true] %s629_s4  ;;  %s632_s19 = int_to_ptr.hbm [resolvable:$true] %s631_s19 }
  0x18   :  { %v121_v5 = vld [vmem:[#allocation5 + $0x50] sm:$0xff]  ;;  %v120_v6 = vld [vmem:[#allocation5 + $0x48] sm:$0xff]  ;;  %v119_v7 = vld [vmem:[#allocation5 + $0x40] sm:$0xff]  ;;  %v939_v43 = vand.u32 127, %v95_v42 }
  0x19   :  { %649 = vmatpush.msra.mxu2 %v125_v1  ;;  %130 = vmatpush.msra.mxu0 %v125_v1  ;;  %v118_v8 = vld [vmem:[#allocation5 + $0x38] sm:$0xff]  ;;  %v117_v9 = vld [vmem:[#allocation5 + $0x30] sm:$0xff]  ;;  %v116_v10 = vld [vmem:[#allocation5 + $0x28] sm:$0xff] }
  0x1a   :  { %v115_v11 = vld [vmem:[#allocation5 + $0x20] sm:$0xff]  ;;  %v114_v12 = vld [vmem:[#allocation5 + $0x18] sm:$0xff]  ;;  %v113_v13 = vld [vmem:[#allocation5 + $0x10] sm:$0xff]  ;;  %vm97_vm0 = vcmp.lt.s32.totalorder %v939_v43, 16 }
  0x1b   :  { %650 = vmatpush.msra.mxu2 %v124_v2  ;;  %131 = vmatpush.msra.mxu0 %v124_v2  ;;  %v112_v14 = vld [vmem:[#allocation5 + $0x8] sm:$0xff]  ;;  %v111_v15 = vld [vmem:[#allocation5] sm:$0xff]  ;;  %v109_v20 = vld [vmem:[#allocation2 + $0x30] sm:$0xff]  ;;  %v646_v47 = vsel %vm97_vm0, 1.0, %v880_v46 }
  0x1c   :  { %v107_v16 = vld [vmem:[#allocation2 + $0x20] sm:$0xff]  ;;  %v108_v18 = vld [vmem:[#allocation2 + $0x28] sm:$0xff]  ;;  %v105_v21 = vld [vmem:[#allocation2 + $0x10] sm:$0xff] }
  0x1d   :  { %651 = vmatpush.msra.mxu2 %v123_v3  ;;  %132 = vmatpush.msra.mxu0 %v123_v3  ;;  %v103_v17 = vld [vmem:[#allocation2] sm:$0xff]  ;;  %v104_v19 = vld [vmem:[#allocation2 + $0x8] sm:$0xff]  ;;  %v110_v22 = vld [vmem:[#allocation2 + $0x38] sm:$0xff] }
  0x1e   :  { %v106_v23 = vld [vmem:[#allocation2 + $0x18] sm:$0xff]  ;;  %v936_v24 = vld [vmem:[#allocation7] sm:$0x7] }
  0x1f   :  { %652 = vmatpush.msra.mxu2 %v122_v4  ;;  %133 = vmatpush.msra.mxu0 %v122_v4  ;;  %v128_v26 = vperm.slane %v936_v24, 0  ;;  %v379_v48 = vld [vmem:[#allocation8 + $0x78] sm:$0xff] }
  0x20   :  { %664 = vmatpush.msra.mxu3 %v379_v48  ;;  %382 = vmatpush.msra.mxu1 %v379_v48 }
  0x21   :  { %653 = vmatpush.msra.mxu2 %v121_v5  ;;  %134 = vmatpush.msra.mxu0 %v121_v5 }
  0x23   :  { %654 = vmatpush.msra.mxu2 %v120_v6  ;;  %135 = vmatpush.msra.mxu0 %v120_v6 }
  0x25   :  { %655 = vmatpush.msra.mxu2 %v119_v7  ;;  %136 = vmatpush.msra.mxu0 %v119_v7 }
  0x27   :  { %656 = vmatpush.msra.mxu2 %v118_v8  ;;  %137 = vmatpush.msra.mxu0 %v118_v8 }
  0x29   :  { %657 = vmatpush.msra.mxu2 %v117_v9  ;;  %138 = vmatpush.msra.mxu0 %v117_v9 }
  0x2b   :  { %658 = vmatpush.msra.mxu2 %v116_v10  ;;  %139 = vmatpush.msra.mxu0 %v116_v10 }
  0x2d   :  { %659 = vmatpush.msra.mxu2 %v115_v11  ;;  %140 = vmatpush.msra.mxu0 %v115_v11 }
  0x2f   :  { %660 = vmatpush.msra.mxu2 %v114_v12  ;;  %141 = vmatpush.msra.mxu0 %v114_v12 }
  0x31   :  { %661 = vmatpush.msra.mxu2 %v113_v13  ;;  %142 = vmatpush.msra.mxu0 %v113_v13 }
  0x33   :  { %662 = vmatpush.msra.mxu2 %v112_v14  ;;  %143 = vmatpush.msra.mxu0 %v112_v14 }
  0x35   :  { %663 = vmatpush.msra.mxu2 %v111_v15  ;;  %144 = vmatpush.msra.mxu0 %v111_v15 }
  0x36   :  { %157 = vmatmul.f32.vlgmr.msra.gmra.mxu2 %v107_v16  ;;  %145 = vmatmul.f32.vlgmr.msra.gmra.mxu0 %v103_v17 }
  0x3e   :  { %160 = vmatmul.f32.gmra.mxu2 %v108_v18  ;;  %148 = vmatmul.f32.gmra.mxu0 %v104_v19 }
  0x46   :  { %163 = vmatmul.f32.gmra.mxu2 %v109_v20  ;;  %151 = vmatmul.f32.gmra.mxu0 %v105_v21 }
  0x4e   :  { %166 = vmatmul.f32.gmra.mxu2 %v110_v22  ;;  %154 = vmatmul.f32.gmra.mxu0 %v106_v23  ;;  %v378_v23 = vld [vmem:[#allocation8 + $0x70] sm:$0xff] }
  0x4f   :  { %665 = vmatpush.msra.mxu3 %v378_v23  ;;  %383 = vmatpush.msra.mxu1 %v378_v23 }
  0xb3   :  { %v146_v25 = vpop.f32.mrf.mxu0 }
  0xb4   :  { %v147_v30 = vadd.f32 %v146_v25, %v128_v26  ;;  %v377_v25 = vld [vmem:[#allocation8 + $0x68] sm:$0xff] }
  0xb5   :  { %666 = vmatpush.msra.mxu3 %v377_v25  ;;  %384 = vmatpush.msra.mxu1 %v377_v25 }
  0xb9   :  { %v158_v27 = vpop.f32.mrf.mxu2 }
  0xba   :  { %v159_v28 = vadd.f32 %v158_v27, %v128_v26  ;;  %v375_v27 = vld [vmem:[#allocation8 + $0x58] sm:$0xff] }
  0xbb   :  { %v149_v29 = vpop.f32.mrf.mxu0 }
  0xbc   :  { %178 = vadd.xlane.f32.xlu0 %v159_v28  ;;  %v150_v34 = vadd.f32 %v149_v29, %v128_v26  ;;  %v373_v29 = vld [vmem:[#allocation8 + $0x48] sm:$0xff] }
  0xc1   :  { %v161_v31 = vpop.f32.mrf.mxu2 }
  0xc2   :  { %v162_v32 = vadd.f32 %v161_v31, %v128_v26  ;;  %v371_v31 = vld [vmem:[#allocation8 + $0x38] sm:$0xff] }
  0xc3   :  { %v152_v33 = vpop.f32.mrf.mxu0 }
  0xc4   :  { %180 = vadd.xlane.f32.xlu1 %v162_v32  ;;  %170 = vadd.xlane.f32.xlu0 %v147_v30  ;;  %v153_v38 = vadd.f32 %v152_v33, %v128_v26  ;;  %v369_v33 = vld [vmem:[#allocation8 + $0x28] sm:$0xff] }
  0xc9   :  { %v164_v35 = vpop.f32.mrf.mxu2 }
  0xca   :  { %v165_v36 = vadd.f32 %v164_v35, %v128_v26  ;;  %v367_v35 = vld [vmem:[#allocation8 + $0x18] sm:$0xff] }
  0xcb   :  { %v155_v37 = vpop.f32.mrf.mxu0 }
  0xcc   :  { %182 = vadd.xlane.f32.xlu2 %v165_v36  ;;  %172 = vadd.xlane.f32.xlu1 %v150_v34  ;;  %v156_v39 = vadd.f32 %v155_v37, %v128_v26  ;;  %v365_v37 = vld [vmem:[#allocation8 + $0x8] sm:$0xff] }
  0xd1   :  { %v167_v40 = vpop.f32.mrf.mxu2 }
  0xd2   :  { %v168_v41 = vadd.f32 %v167_v40, %v128_v26  ;;  %v376_v26 = vld [vmem:[#allocation8 + $0x60] sm:$0xff] }
  0xd3   :  { %667 = vmatpush.msra.mxu3 %v376_v26  ;;  %385 = vmatpush.msra.mxu1 %v376_v26 }
  0xd4   :  { %174 = vadd.xlane.f32.xlu2 %v153_v38  ;;  %176 = vadd.xlane.f32.xlu1 %v156_v39 }
  0xd5   :  { %184 = vadd.xlane.f32.xlu0 %v168_v41  ;;  %668 = vmatpush.msra.mxu3 %v375_v27 }
  0xd6   :  { %386 = vmatpush.msra.mxu1 %v375_v27 }
 0x12f   :  { %v179_v44 = vpop.xlane.xlu0 %178 }
 0x130   :  { %v190_v45 = vmul.f32 0.0625, %v179_v44 }
 0x132   :  { %v198_v49 = vsub.f32 %v159_v28, %v190_v45  ;;  %v374_v28 = vld [vmem:[#allocation8 + $0x50] sm:$0xff] }
 0x133   :  { %669 = vmatpush.msra.mxu3 %v374_v28  ;;  %387 = vmatpush.msra.mxu1 %v374_v28 }
 0x134   :  { %v943_v50 = vmul.f32 %v646_v47, %v198_v49 }
 0x135   :  { %670 = vmatpush.msra.mxu3 %v373_v29  ;;  %388 = vmatpush.msra.mxu1 %v373_v29 }
 0x136   :  { %v214_v51 = vmul.f32 %v943_v50, %v943_v50 }
 0x137   :  { %v181_v52 = vpop.xlane.xlu1 %180  ;;  %v171_v53 = vpop.xlane.xlu0 %170 }
 0x138   :  { %v191_v54 = vmul.f32 0.0625, %v181_v52  ;;  %v186_v55 = vmul.f32 0.0625, %v171_v53  ;;  %226 = vadd.xlane.f32.xlu2 %v214_v51 }
 0x13a   :  { %v199_v56 = vsub.f32 %v162_v32, %v191_v54  ;;  %v194_v57 = vsub.f32 %v147_v30, %v186_v55  ;;  %v372_v30 = vld [vmem:[#allocation8 + $0x40] sm:$0xff]  ;;  %v370_v32 = vld [vmem:[#allocation8 + $0x30] sm:$0xff] }
 0x13b   :  { %671 = vmatpush.msra.mxu3 %v372_v30  ;;  %389 = vmatpush.msra.mxu1 %v372_v30 }
 0x13c   :  { %v947_v58 = vmul.f32 %v646_v47, %v199_v56  ;;  %v949_v59 = vmul.f32 %v646_v47, %v194_v57 }
 0x13d   :  { %672 = vmatpush.msra.mxu3 %v371_v31  ;;  %390 = vmatpush.msra.mxu1 %v371_v31 }
 0x13e   :  { %v215_v60 = vmul.f32 %v947_v58, %v947_v58  ;;  %v210_v61 = vmul.f32 %v949_v59, %v949_v59 }
 0x13f   :  { %v183_v62 = vpop.xlane.xlu2 %182  ;;  %v173_v63 = vpop.xlane.xlu1 %172  ;;  %673 = vmatpush.msra.mxu3 %v370_v32  ;;  %391 = vmatpush.msra.mxu1 %v370_v32 }
 0x140   :  { %v192_v0 = vmul.f32 0.0625, %v183_v62  ;;  %v187_v1 = vmul.f32 0.0625, %v173_v63  ;;  %228 = vadd.xlane.f32.xlu1 %v215_v60  ;;  %218 = vadd.xlane.f32.xlu0 %v210_v61 }
 0x141   :  { %674 = vmatpush.msra.mxu3 %v369_v33  ;;  %392 = vmatpush.msra.mxu1 %v369_v33 }
 0x142   :  { %v200_v2 = vsub.f32 %v165_v36, %v192_v0  ;;  %v195_v3 = vsub.f32 %v150_v34, %v187_v1  ;;  %v368_v34 = vld [vmem:[#allocation8 + $0x20] sm:$0xff]  ;;  %v366_v36 = vld [vmem:[#allocation8 + $0x10] sm:$0xff] }
 0x143   :  { %675 = vmatpush.msra.mxu3 %v368_v34  ;;  %393 = vmatpush.msra.mxu1 %v368_v34 }
 0x144   :  { %v955_v4 = vmul.f32 %v646_v47, %v195_v3  ;;  %v957_v5 = vmul.f32 %v646_v47, %v200_v2 }
 0x145   :  { %676 = vmatpush.msra.mxu3 %v367_v35  ;;  %394 = vmatpush.msra.mxu1 %v367_v35 }
 0x146   :  { %v211_v6 = vmul.f32 %v955_v4, %v955_v4  ;;  %v216_v7 = vmul.f32 %v957_v5, %v957_v5 }
 0x147   :  { %v175_v8 = vpop.xlane.xlu2 %174  ;;  %v177_v9 = vpop.xlane.xlu1 %176  ;;  %677 = vmatpush.msra.mxu3 %v366_v36  ;;  %395 = vmatpush.msra.mxu1 %v366_v36 }
 0x148   :  { %v188_v10 = vmul.f32 0.0625, %v175_v8  ;;  %v189_v11 = vmul.f32 0.0625, %v177_v9  ;;  %v185_v12 = vpop.xlane.xlu0 %184  ;;  %220 = vadd.xlane.f32.xlu2 %v211_v6  ;;  %230 = vadd.xlane.f32.xlu0 %v216_v7  ;;  %v981_v7 = vperm.slane %v936_v24, 1 }
 0x149   :  { %v193_v13 = vmul.f32 0.0625, %v185_v12  ;;  %678 = vmatpush.msra.mxu3 %v365_v37  ;;  %396 = vmatpush.msra.mxu1 %v365_v37  ;;  %v986_v12 = vperm.slane %v936_v24, 2 }
 0x14a   :  { %v196_v14 = vsub.f32 %v153_v38, %v188_v10  ;;  %v197_v15 = vsub.f32 %v156_v39, %v189_v11  ;;  %v364_v38 = vld [vmem:[#allocation8] sm:$0xff] }
 0x14b   :  { %v201_v16 = vsub.f32 %v168_v41, %v193_v13  ;;  %679 = vmatpush.msra.mxu3 %v364_v38  ;;  %397 = vmatpush.msra.mxu1 %v364_v38 }
 0x14c   :  { %v963_v17 = vmul.f32 %v646_v47, %v196_v14  ;;  %v965_v18 = vmul.f32 %v646_v47, %v197_v15 }
 0x14d   :  { %v967_v19 = vmul.f32 %v646_v47, %v201_v16 }
 0x14e   :  { %v212_v20 = vmul.f32 %v963_v17, %v963_v17  ;;  %v213_v21 = vmul.f32 %v965_v18, %v965_v18 }
 0x14f   :  { %v217_v22 = vmul.f32 %v967_v19, %v967_v19 }
 0x150   :  { %222 = vadd.xlane.f32.xlu1 %v212_v20  ;;  %224 = vadd.xlane.f32.xlu0 %v213_v21 }
 0x151   :  { %232 = vadd.xlane.f32.xlu2 %v217_v22 }
 0x1ab   :  { %v227_v39 = vpop.xlane.xlu2 %226 }
 0x1ac   :  { %v238_v40 = vmul.f32 0.0625, %v227_v39 }
 0x1ae   :  { %v246_v41 = vadd.f32 1e-05, %v238_v40 }
 0x1b0   :  { %689 = vrsqrt.f32 %v246_v41  ;;  %vm296_vm2 = vweird.f32 %v246_v41 }
 0x1b3   :  { %v229_v42 = vpop.xlane.xlu1 %228  ;;  %v219_v44 = vpop.xlane.xlu0 %218 }
 0x1b4   :  { %v239_v45 = vmul.f32 0.0625, %v229_v42  ;;  %v234_v47 = vmul.f32 0.0625, %v219_v44 }
 0x1b6   :  { %v690_v48 = vpop.eup %689  ;;  %v247_v49 = vadd.f32 1e-05, %v239_v45  ;;  %v242_v51 = vadd.f32 1e-05, %v234_v47 }
 0x1b7   :  { %v291_v52 = vmul.f32 %v690_v48, %v246_v41  ;;  %vm297_vm1 = vweird.f32 %v690_v48 }
 0x1b8   :  { %691 = vrsqrt.f32 %v247_v49  ;;  %vm298_vm3 = vmor %vm296_vm2, %vm297_vm1  ;;  %vm306_vm6 = vweird.f32 %v247_v49  ;;  %vm256_vm8 = vweird.f32 %v242_v51 }
 0x1b9   :  { %v292_v53 = vmul.f32 %v690_v48, %v291_v52  ;;  %693 = vrsqrt.f32 %v242_v51 }
 0x1bb   :  { %v293_v54 = vmul.f32 0.5, %v292_v53  ;;  %v221_v55 = vpop.xlane.xlu2 %220  ;;  %v231_v56 = vpop.xlane.xlu0 %230 }
 0x1bc   :  { %v235_v57 = vmul.f32 0.0625, %v221_v55  ;;  %v240_v60 = vmul.f32 0.0625, %v231_v56 }
 0x1bd   :  { %v294_v61 = vsub.f32 1.5, %v293_v54 }
 0x1be   :  { %v692_v62 = vpop.eup %691  ;;  %v975_v63 = vadd.f32 1e-05, %v235_v57  ;;  %v977_v0 = vadd.f32 1e-05, %v240_v60 }
 0x1bf   :  { %v694_v1 = vpop.eup %693  ;;  %v295_v2 = vmul.f32 %v690_v48, %v294_v61  ;;  %v301_v3 = vmul.f32 %v692_v62, %v247_v49  ;;  %vm307_vm4 = vweird.f32 %v692_v62 }
 0x1c0   :  { %v251_v6 = vmul.f32 %v694_v1, %v242_v51  ;;  %695 = vrsqrt.f32 %v975_v63  ;;  %vm257_vm5 = vweird.f32 %v694_v1  ;;  %vm308_vm7 = vmor %vm306_vm6, %vm307_vm4  ;;  %vm266_vm12 = vweird.f32 %v975_v63 }
 0x1c1   :  { %v302_v8 = vmul.f32 %v692_v62, %v301_v3  ;;  %697 = vrsqrt.f32 %v977_v0  ;;  %v299_v9 = vsel %vm298_vm3, %v690_v48, %v295_v2  ;;  %vm258_vm9 = vmor %vm256_vm8, %vm257_vm5  ;;  %vm316_vm14 = vweird.f32 %v977_v0 }
 0x1c2   :  { %v252_v10 = vmul.f32 %v694_v1, %v251_v6  ;;  %v334_v11 = vmul.f32 %v299_v9, %v943_v50 }
 0x1c3   :  { %v303_v13 = vmul.f32 0.5, %v302_v8  ;;  %v223_v14 = vpop.xlane.xlu1 %222  ;;  %v225_v15 = vpop.xlane.xlu0 %224 }
 0x1c4   :  { %v253_v16 = vmul.f32 0.5, %v252_v10  ;;  %v236_v20 = vmul.f32 0.0625, %v223_v14  ;;  %v233_v21 = vpop.xlane.xlu2 %232  ;;  %v237_v22 = vmul.f32 0.0625, %v225_v15  ;;  %v343_v23 = vmul.f32 %v981_v7, %v334_v11 }
 0x1c5   :  { %v304_v25 = vsub.f32 1.5, %v303_v13  ;;  %v241_v26 = vmul.f32 0.0625, %v233_v21 }
 0x1c6   :  { %v696_v27 = vpop.eup %695  ;;  %v254_v28 = vsub.f32 1.5, %v253_v16  ;;  %v989_v29 = vadd.f32 1e-05, %v236_v20  ;;  %v991_v50 = vadd.f32 1e-05, %v237_v22  ;;  %v352_v24 = vadd.f32 %v986_v12, %v343_v23 }
 0x1c7   :  { %v698_v30 = vpop.eup %697  ;;  %v305_v31 = vmul.f32 %v692_v62, %v304_v25  ;;  %v261_v32 = vmul.f32 %v696_v27, %v975_v63  ;;  %v995_v33 = vadd.f32 1e-05, %v241_v26  ;;  %vm267_vm10 = vweird.f32 %v696_v27 }
 0x1c8   :  { %v255_v34 = vmul.f32 %v694_v1, %v254_v28  ;;  %v311_v35 = vmul.f32 %v698_v30, %v977_v0  ;;  %699 = vrsqrt.f32 %v989_v29  ;;  %v360_v38 = vmax.f32 %v352_v24, 0.0  ;;  %vm1008_vm13 = vmor %vm266_vm12, %vm267_vm10 }
 0x1c9   :  { %v262_v36 = vmul.f32 %v696_v27, %v261_v32  ;;  %701 = vrsqrt.f32 %v995_v33  ;;  %v309_v41 = vsel %vm308_vm7, %v692_v62, %v305_v31  ;;  %vm317_vm11 = vweird.f32 %v698_v30 }
 0x1ca   :  { %v312_v37 = vmul.f32 %v698_v30, %v311_v35  ;;  %703 = vrsqrt.f32 %v991_v50  ;;  %v259_v40 = vsel %vm258_vm9, %v694_v1, %v255_v34  ;;  %410 = vmatmul.f32.vlgmr.msra.gmra.mxu3 %v360_v38  ;;  %v335_v45 = vmul.f32 %v309_v41, %v947_v58  ;;  %vm318_vm15 = vmor %vm316_vm14, %vm317_vm11 }
 0x1cb   :  { %v263_v39 = vmul.f32 0.5, %v262_v36  ;;  %v330_v44 = vmul.f32 %v259_v40, %v949_v59  ;;  %vm276_vm1 = vweird.f32 %v989_v29  ;;  %vm326_vm5 = vweird.f32 %v995_v33  ;;  %v1037_v40 = vld [vmem:[#allocation10] sm:$0x7] }
 0x1cc   :  { %v313_v42 = vmul.f32 0.5, %v312_v37  ;;  %v344_v52 = vmul.f32 %v981_v7, %v335_v45  ;;  %vm286_vm7 = vweird.f32 %v991_v50  ;;  %vm100_vm9 = vcmp.lt.s32.totalorder %v939_v43, 32 }
 0x1cd   :  { %v264_v47 = vsub.f32 1.5, %v263_v39  ;;  %v339_v51 = vmul.f32 %v981_v7, %v330_v44 }
 0x1ce   :  { %v700_v48 = vpop.eup %699  ;;  %v314_v49 = vsub.f32 1.5, %v313_v42  ;;  %v353_v63 = vadd.f32 %v986_v12, %v344_v52  ;;  %v381_v42 = vperm.slane %v1037_v40, 0 }
 0x1cf   :  { %v702_v53 = vpop.eup %701  ;;  %v265_v54 = vmul.f32 %v696_v27, %v264_v47  ;;  %v271_v55 = vmul.f32 %v700_v48, %v989_v29  ;;  %v348_v60 = vadd.f32 %v986_v12, %v339_v51  ;;  %vm277_vm0 = vweird.f32 %v700_v48 }
 0x1d0   :  { %v704_v56 = vpop.eup %703  ;;  %v315_v58 = vmul.f32 %v698_v30, %v314_v49  ;;  %v321_v57 = vmul.f32 %v702_v53, %v995_v33  ;;  %v361_v10 = vmax.f32 %v353_v63, 0.0  ;;  %vm327_vm2 = vweird.f32 %v702_v53  ;;  %vm278_vm4 = vmor %vm276_vm1, %vm277_vm0 }
 0x1d1   :  { %v272_v61 = vmul.f32 %v700_v48, %v271_v55  ;;  %v281_v62 = vmul.f32 %v704_v56, %v991_v50  ;;  %v356_v2 = vmax.f32 %v348_v60, 0.0  ;;  %v269_v3 = vsel %vm1008_vm13, %v696_v27, %v265_v54  ;;  %vm328_vm6 = vmor %vm326_vm5, %vm327_vm2 }
 0x1d2   :  { %v322_v1 = vmul.f32 %v702_v53, %v321_v57  ;;  %v319_v6 = vsel %vm318_vm15, %v698_v30, %v315_v58  ;;  %v331_v0 = vmul.f32 %v269_v3, %v955_v4  ;;  %413 = vmatmul.f32.gmra.mxu3 %v361_v10  ;;  %vm287_vm3 = vweird.f32 %v704_v56 }
 0x1d3   :  { %v273_v8 = vmul.f32 0.5, %v272_v61  ;;  %v282_v9 = vmul.f32 %v704_v56, %v281_v62  ;;  %398 = vmatmul.f32.vlgmr.msra.gmra.mxu1 %v356_v2  ;;  %v336_v13 = vmul.f32 %v319_v6, %v957_v5  ;;  %vm288_vm8 = vmor %vm286_vm7, %vm287_vm3  ;;  %v647_v60 = vsel %vm100_vm9, 1.0, %v880_v46 }
 0x1d4   :  { %v323_v11 = vmul.f32 0.5, %v322_v1  ;;  %v340_v16 = vmul.f32 %v981_v7, %v331_v0 }
 0x1d5   :  { %v274_v14 = vsub.f32 1.5, %v273_v8  ;;  %v283_v15 = vmul.f32 0.5, %v282_v9  ;;  %v345_v21 = vmul.f32 %v981_v7, %v336_v13 }
 0x1d6   :  { %v324_v20 = vsub.f32 1.5, %v323_v11  ;;  %v349_v4 = vadd.f32 %v986_v12, %v340_v16 }
 0x1d7   :  { %v275_v22 = vmul.f32 %v700_v48, %v274_v14  ;;  %v284_v23 = vsub.f32 1.5, %v283_v15  ;;  %v354_v5 = vadd.f32 %v986_v12, %v345_v21 }
 0x1d8   :  { %v325_v25 = vmul.f32 %v702_v53, %v324_v20  ;;  %v357_v27 = vmax.f32 %v349_v4, 0.0 }
 0x1d9   :  { %v285_v26 = vmul.f32 %v704_v56, %v284_v23  ;;  %v279_v28 = vsel %vm278_vm4, %v700_v48, %v275_v22  ;;  %v362_v29 = vmax.f32 %v354_v5, 0.0 }
 0x1da   :  { %v332_v24 = vmul.f32 %v279_v28, %v963_v17  ;;  %v329_v30 = vsel %vm328_vm6, %v702_v53, %v325_v25 }
 0x1db   :  { %v337_v31 = vmul.f32 %v329_v30, %v967_v19  ;;  %v289_v32 = vsel %vm288_vm8, %v704_v56, %v285_v26  ;;  %401 = vmatmul.f32.gmra.mxu1 %v357_v27  ;;  %416 = vmatmul.f32.gmra.mxu3 %v362_v29 }
 0x1dc   :  { %v341_v34 = vmul.f32 %v981_v7, %v332_v24  ;;  %v333_v50 = vmul.f32 %v289_v32, %v965_v18 }
 0x1dd   :  { %v346_v33 = vmul.f32 %v981_v7, %v337_v31 }
 0x1de   :  { %v350_v35 = vadd.f32 %v986_v12, %v341_v34  ;;  %v342_v17 = vmul.f32 %v981_v7, %v333_v50 }
 0x1df   :  { %v355_v36 = vadd.f32 %v986_v12, %v346_v33 }
 0x1e0   :  { %v358_v37 = vmax.f32 %v350_v35, 0.0  ;;  %v351_v19 = vadd.f32 %v986_v12, %v342_v17 }
 0x1e1   :  { %v363_v38 = vmax.f32 %v355_v36, 0.0 }
 0x1e2   :  { %v359_v39 = vmax.f32 %v351_v19, 0.0 }
 0x1e3   :  { %404 = vmatmul.f32.gmra.mxu1 %v358_v37  ;;  %419 = vmatmul.f32.gmra.mxu3 %v363_v38 }
 0x1eb   :  { %407 = vmatmul.f32.gmra.mxu1 %v359_v39 }
 0x24d   :  { %v411_v41 = vpop.f32.mrf.mxu3 }
 0x24e   :  { %v412_v51 = vadd.f32 %v411_v41, %v381_v42 }
 0x250   :  { %v399_v44 = vpop.f32.mrf.mxu1 }
 0x251   :  { %v400_v45 = vadd.f32 %v399_v44, %v381_v42 }
 0x253   :  { %423 = vadd.xlane.f32.xlu1 %v400_v45 }
 0x255   :  { %v414_v18 = vpop.f32.mrf.mxu3 }
 0x256   :  { %v415_v54 = vadd.f32 %v414_v18, %v381_v42 }
 0x258   :  { %v402_v47 = vpop.f32.mrf.mxu1 }
 0x259   :  { %v403_v48 = vadd.f32 %v402_v47, %v381_v42 }
 0x25b   :  { %425 = vadd.xlane.f32.xlu2 %v403_v48 }
 0x25e   :  { %v417_v49 = vpop.f32.mrf.mxu3 }
 0x25f   :  { %v418_v59 = vadd.f32 %v417_v49, %v381_v42 }
 0x260   :  { %v405_v7 = vpop.f32.mrf.mxu1 }
 0x261   :  { %v406_v52 = vadd.f32 %v405_v7, %v381_v42 }
 0x263   :  { %427 = vadd.xlane.f32.xlu0 %v406_v52  ;;  %431 = vadd.xlane.f32.xlu2 %v412_v51 }
 0x266   :  { %v420_v12 = vpop.f32.mrf.mxu3 }
 0x267   :  { %v421_v55 = vadd.f32 %v420_v12, %v381_v42 }
 0x268   :  { %v408_v53 = vpop.f32.mrf.mxu1 }
 0x269   :  { %v409_v56 = vadd.f32 %v408_v53, %v381_v42 }
 0x26b   :  { %433 = vadd.xlane.f32.xlu0 %v415_v54  ;;  %437 = vadd.xlane.f32.xlu2 %v421_v55 }
 0x26c   :  { %429 = vadd.xlane.f32.xlu1 %v409_v56 }
 0x274   :  { %435 = vadd.xlane.f32.xlu1 %v418_v59 }
 0x2c6   :  { %v424_v58 = vpop.xlane.xlu1 %423 }
 0x2c7   :  { %v439_v57 = vmul.f32 0.03125, %v424_v58 }
 0x2c9   :  { %v447_v61 = vsub.f32 %v400_v45, %v439_v57  ;;  %v1081_v57 = vperm.slane %v1037_v40, 2 }
 0x2cb   :  { %v1042_v62 = vmul.f32 %v647_v60, %v447_v61 }
 0x2cd   :  { %v463_v63 = vmul.f32 %v1042_v62, %v1042_v62 }
 0x2ce   :  { %v426_v1 = vpop.xlane.xlu2 %425 }
 0x2cf   :  { %v440_v2 = vmul.f32 0.03125, %v426_v1  ;;  %471 = vadd.xlane.f32.xlu0 %v463_v63 }
 0x2d1   :  { %v448_v3 = vsub.f32 %v403_v48, %v440_v2 }
 0x2d3   :  { %v1046_v6 = vmul.f32 %v647_v60, %v448_v3 }
 0x2d5   :  { %v464_v8 = vmul.f32 %v1046_v6, %v1046_v6 }
 0x2d6   :  { %v432_v43 = vpop.xlane.xlu2 %431  ;;  %v428_v9 = vpop.xlane.xlu0 %427 }
 0x2d7   :  { %v443_v10 = vmul.f32 0.03125, %v432_v43  ;;  %v441_v0 = vmul.f32 0.03125, %v428_v9  ;;  %473 = vadd.xlane.f32.xlu1 %v464_v8 }
 0x2d9   :  { %v451_v46 = vsub.f32 %v412_v51, %v443_v10  ;;  %v449_v11 = vsub.f32 %v406_v52, %v441_v0 }
 0x2db   :  { %v1050_v13 = vmul.f32 %v647_v60, %v451_v46  ;;  %v1052_v14 = vmul.f32 %v647_v60, %v449_v11 }
 0x2dd   :  { %v467_v15 = vmul.f32 %v1050_v13, %v1050_v13  ;;  %v465_v16 = vmul.f32 %v1052_v14, %v1052_v14 }
 0x2de   :  { %v438_v20 = vpop.xlane.xlu2 %437  ;;  %v434_v21 = vpop.xlane.xlu0 %433 }
 0x2df   :  { %v446_v22 = vmul.f32 0.03125, %v438_v20  ;;  %v430_v23 = vpop.xlane.xlu1 %429  ;;  %v444_v4 = vmul.f32 0.03125, %v434_v21  ;;  %479 = vadd.xlane.f32.xlu1 %v467_v15  ;;  %475 = vadd.xlane.f32.xlu2 %v465_v16 }
 0x2e0   :  { %v442_v25 = vmul.f32 0.03125, %v430_v23 }
 0x2e1   :  { %v454_v5 = vsub.f32 %v421_v55, %v446_v22  ;;  %v452_v26 = vsub.f32 %v415_v54, %v444_v4 }
 0x2e2   :  { %v450_v27 = vsub.f32 %v409_v56, %v442_v25  ;;  %v1077_v56 = vperm.slane %v1037_v40, 1 }
 0x2e3   :  { %v1058_v28 = vmul.f32 %v647_v60, %v454_v5  ;;  %v1060_v29 = vmul.f32 %v647_v60, %v452_v26 }
 0x2e4   :  { %v1062_v24 = vmul.f32 %v647_v60, %v450_v27 }
 0x2e5   :  { %v470_v30 = vmul.f32 %v1058_v28, %v1058_v28  ;;  %v468_v31 = vmul.f32 %v1060_v29, %v1060_v29 }
 0x2e6   :  { %v466_v32 = vmul.f32 %v1062_v24, %v1062_v24 }
 0x2e7   :  { %v436_v34 = vpop.xlane.xlu1 %435  ;;  %485 = vadd.xlane.f32.xlu1 %v470_v30  ;;  %481 = vadd.xlane.f32.xlu2 %v468_v31 }
 0x2e8   :  { %v445_v33 = vmul.f32 0.03125, %v436_v34  ;;  %477 = vadd.xlane.f32.xlu0 %v466_v32 }
 0x2ea   :  { %v453_v35 = vsub.f32 %v418_v59, %v445_v33 }
 0x2ec   :  { %v1070_v50 = vmul.f32 %v647_v60, %v453_v35 }
 0x2ee   :  { %v469_v36 = vmul.f32 %v1070_v50, %v1070_v50 }
 0x2f0   :  { %483 = vadd.xlane.f32.xlu0 %v469_v36 }
 0x342   :  { %v472_v37 = vpop.xlane.xlu0 %471 }
 0x343   :  { %v487_v38 = vmul.f32 0.03125, %v472_v37 }
 0x345   :  { %v495_v17 = vadd.f32 1e-05, %v487_v38 }
 0x347   :  { %705 = vrsqrt.f32 %v495_v17  ;;  %vm509_vm11 = vweird.f32 %v495_v17 }
 0x34a   :  { %v474_v19 = vpop.xlane.xlu1 %473 }
 0x34b   :  { %v488_v39 = vmul.f32 0.03125, %v474_v19 }
 0x34d   :  { %v706_v41 = vpop.eup %705  ;;  %v496_v42 = vadd.f32 1e-05, %v488_v39 }
 0x34e   :  { %v504_v44 = vmul.f32 %v706_v41, %v495_v17  ;;  %vm510_vm10 = vweird.f32 %v706_v41 }
 0x34f   :  { %707 = vrsqrt.f32 %v496_v42  ;;  %vm511_vm12 = vmor %vm509_vm11, %vm510_vm10  ;;  %vm519_vm14 = vweird.f32 %v496_v42 }
 0x350   :  { %v505_v45 = vmul.f32 %v706_v41, %v504_v44 }
 0x352   :  { %v506_v18 = vmul.f32 0.5, %v505_v45  ;;  %v480_v47 = vpop.xlane.xlu1 %479  ;;  %v476_v48 = vpop.xlane.xlu2 %475 }
 0x353   :  { %v491_v49 = vmul.f32 0.03125, %v480_v47  ;;  %v489_v7 = vmul.f32 0.03125, %v476_v48 }
 0x354   :  { %v507_v51 = vsub.f32 1.5, %v506_v18 }
 0x355   :  { %v708_v52 = vpop.eup %707  ;;  %v499_v12 = vadd.f32 1e-05, %v491_v49  ;;  %v1074_v53 = vadd.f32 1e-05, %v489_v7 }
 0x356   :  { %v508_v54 = vmul.f32 %v706_v41, %v507_v51  ;;  %v514_v55 = vmul.f32 %v708_v52, %v496_v42  ;;  %vm520_vm13 = vweird.f32 %v708_v52 }
 0x357   :  { %709 = vrsqrt.f32 %v499_v12  ;;  %vm521_vm15 = vmor %vm519_vm14, %vm520_vm13  ;;  %vm549_vm2 = vweird.f32 %v499_v12  ;;  %vm529_vm4 = vweird.f32 %v1074_v53 }
 0x358   :  { %v512_v59 = vsel %vm511_vm12, %v706_v41, %v508_v54  ;;  %v515_v58 = vmul.f32 %v708_v52, %v514_v55  ;;  %711 = vrsqrt.f32 %v1074_v53 }
 0x359   :  { %v583_v60 = vmul.f32 %v512_v59, %v1042_v62 }
 0x35a   :  { %v516_v61 = vmul.f32 0.5, %v515_v58  ;;  %v486_v63 = vpop.xlane.xlu1 %485  ;;  %v482_v1 = vpop.xlane.xlu2 %481 }
 0x35b   :  { %v592_v2 = vmul.f32 %v1077_v56, %v583_v60  ;;  %v494_v3 = vmul.f32 0.03125, %v486_v63  ;;  %v492_v8 = vmul.f32 0.03125, %v482_v1  ;;  %v478_v43 = vpop.xlane.xlu0 %477 }
 0x35c   :  { %v517_v9 = vsub.f32 1.5, %v516_v61  ;;  %v490_v10 = vmul.f32 0.03125, %v478_v43 }
 0x35d   :  { %v710_v0 = vpop.eup %709  ;;  %v601_v46 = vadd.f32 %v1081_v57, %v592_v2  ;;  %v1086_v11 = vadd.f32 1e-05, %v494_v3  ;;  %v1088_v40 = vadd.f32 1e-05, %v492_v8 }
 0x35e   :  { %v712_v15 = vpop.eup %711  ;;  %v518_v62 = vmul.f32 %v708_v52, %v517_v9  ;;  %v544_v16 = vmul.f32 %v710_v0, %v499_v12  ;;  %v1090_v20 = vadd.f32 1e-05, %v490_v10  ;;  %vm550_vm0 = vweird.f32 %v710_v0 }
 0x35f   :  { %v609_v21 = vmax.f32 %v601_v46, 0.0  ;;  %v524_v22 = vmul.f32 %v712_v15, %v1074_v53  ;;  %713 = vrsqrt.f32 %v1086_v11  ;;  %vm530_vm1 = vweird.f32 %v712_v15  ;;  %vm551_vm3 = vmor %vm549_vm2, %vm550_vm0 }
 0x360   :  { %v522_v23 = vsel %vm521_vm15, %v708_v52, %v518_v62  ;;  %v545_v4 = vmul.f32 %v710_v0, %v544_v16  ;;  %715 = vrsqrt.f32 %v1088_v40  ;;  %vm531_vm5 = vmor %vm529_vm4, %vm530_vm1  ;;  %vm579_vm7 = vweird.f32 %v1086_v11 }
 0x361   :  { %617 = vst [vmem:[#allocation11] sm:$0xff] %v609_v21  ;;  %v584_v25 = vmul.f32 %v522_v23, %v1046_v6  ;;  %v525_v5 = vmul.f32 %v712_v15, %v524_v22  ;;  %717 = vrsqrt.f32 %v1090_v20  ;;  %vm559_vm11 = vweird.f32 %v1088_v40 }
 0x362   :  { %v546_v26 = vmul.f32 0.5, %v545_v4  ;;  %vm539_vm12 = vweird.f32 %v1090_v20 }
 0x363   :  { %v593_v27 = vmul.f32 %v1077_v56, %v584_v25  ;;  %v526_v30 = vmul.f32 0.5, %v525_v5  ;;  %v484_v31 = vpop.xlane.xlu0 %483 }
 0x364   :  { %v547_v32 = vsub.f32 1.5, %v546_v26  ;;  %v493_v34 = vmul.f32 0.03125, %v484_v31 }
 0x365   :  { %v714_v33 = vpop.eup %713  ;;  %v602_v35 = vadd.f32 %v1081_v57, %v593_v27  ;;  %v527_v36 = vsub.f32 1.5, %v526_v30 }
 0x366   :  { %v716_v37 = vpop.eup %715  ;;  %v548_v38 = vmul.f32 %v710_v0, %v547_v32  ;;  %v574_v6 = vmul.f32 %v714_v33, %v1086_v11  ;;  %v1100_v17 = vadd.f32 1e-05, %v493_v34  ;;  %vm580_vm6 = vweird.f32 %v714_v33 }
 0x367   :  { %v718_v19 = vpop.eup %717  ;;  %v610_v39 = vmax.f32 %v602_v35, 0.0  ;;  %v528_v41 = vmul.f32 %v712_v15, %v527_v36  ;;  %v554_v42 = vmul.f32 %v716_v37, %v1088_v40  ;;  %vm560_vm8 = vweird.f32 %v716_v37  ;;  %vm581_vm10 = vmor %vm579_vm7, %vm580_vm6 }
 0x368   :  { %v552_v44 = vsel %vm551_vm3, %v710_v0, %v548_v38  ;;  %v575_v45 = vmul.f32 %v714_v33, %v574_v6  ;;  %v534_v18 = vmul.f32 %v718_v19, %v1090_v20  ;;  %719 = vrsqrt.f32 %v1100_v17  ;;  %vm561_vm13 = vmor %vm559_vm11, %vm560_vm8 }
 0x369   :  { %618 = vst [vmem:[#allocation11 + $0x8] sm:$0xff] %v610_v39  ;;  %v587_v47 = vmul.f32 %v552_v44, %v1050_v13  ;;  %v532_v48 = vsel %vm531_vm5, %v712_v15, %v528_v41  ;;  %v555_v49 = vmul.f32 %v716_v37, %v554_v42  ;;  %vm540_vm9 = vweird.f32 %v718_v19 }
 0x36a   :  { %v585_v7 = vmul.f32 %v532_v48, %v1052_v14  ;;  %v576_v51 = vmul.f32 0.5, %v575_v45  ;;  %v535_v52 = vmul.f32 %v718_v19, %v534_v18  ;;  %vm541_vm14 = vmor %vm539_vm12, %vm540_vm9  ;;  %vm569_vm0 = vweird.f32 %v1100_v17 }
 0x36b   :  { %v596_v12 = vmul.f32 %v1077_v56, %v587_v47  ;;  %v556_v53 = vmul.f32 0.5, %v555_v49 }
 0x36c   :  { %v594_v54 = vmul.f32 %v1077_v56, %v585_v7  ;;  %v577_v55 = vsub.f32 1.5, %v576_v51  ;;  %v536_v59 = vmul.f32 0.5, %v535_v52 }
 0x36d   :  { %v605_v58 = vadd.f32 %v1081_v57, %v596_v12  ;;  %v557_v13 = vsub.f32 1.5, %v556_v53 }
 0x36e   :  { %v603_v60 = vadd.f32 %v1081_v57, %v594_v54  ;;  %v578_v61 = vmul.f32 %v714_v33, %v577_v55  ;;  %v537_v14 = vsub.f32 1.5, %v536_v59  ;;  %v720_v63 = vpop.eup %719 }
 0x36f   :  { %v613_v1 = vmax.f32 %v605_v58, 0.0  ;;  %v558_v2 = vmul.f32 %v716_v37, %v557_v13  ;;  %v564_v9 = vmul.f32 %v720_v63, %v1100_v17  ;;  %vm570_vm15 = vweird.f32 %v720_v63 }
 0x370   :  { %v611_v3 = vmax.f32 %v603_v60, 0.0  ;;  %v582_v8 = vsel %vm581_vm10, %v714_v33, %v578_v61  ;;  %v538_v43 = vmul.f32 %v718_v19, %v537_v14  ;;  %vm571_vm1 = vmor %vm569_vm0, %vm570_vm15 }
 0x371   :  { %621 = vst [vmem:[#allocation11 + $0x20] sm:$0xff] %v613_v1  ;;  %v590_v10 = vmul.f32 %v582_v8, %v1058_v28  ;;  %v562_v0 = vsel %vm561_vm13, %v716_v37, %v558_v2  ;;  %v565_v15 = vmul.f32 %v720_v63, %v564_v9 }
 0x372   :  { %619 = vst [vmem:[#allocation11 + $0x10] sm:$0xff] %v611_v3  ;;  %v588_v46 = vmul.f32 %v562_v0, %v1060_v29  ;;  %v542_v11 = vsel %vm541_vm14, %v718_v19, %v538_v43 }
 0x373   :  { %v599_v40 = vmul.f32 %v1077_v56, %v590_v10  ;;  %v586_v62 = vmul.f32 %v542_v11, %v1062_v24  ;;  %v566_v20 = vmul.f32 0.5, %v565_v15 }
 0x374   :  { %v597_v16 = vmul.f32 %v1077_v56, %v588_v46 }
 0x375   :  { %v608_v21 = vadd.f32 %v1081_v57, %v599_v40  ;;  %v595_v22 = vmul.f32 %v1077_v56, %v586_v62  ;;  %v567_v23 = vsub.f32 1.5, %v566_v20 }
 0x376   :  { %v606_v28 = vadd.f32 %v1081_v57, %v597_v16 }
 0x377   :  { %v616_v4 = vmax.f32 %v608_v21, 0.0  ;;  %v604_v29 = vadd.f32 %v1081_v57, %v595_v22  ;;  %v568_v5 = vmul.f32 %v720_v63, %v567_v23 }
 0x378   :  { %v614_v25 = vmax.f32 %v606_v28, 0.0 }
 0x379   :  { %624 = vst [vmem:[#allocation11 + $0x38] sm:$0xff] %v616_v4  ;;  %v612_v24 = vmax.f32 %v604_v29, 0.0  ;;  %v572_v26 = vsel %vm571_vm1, %v720_v63, %v568_v5 }
 0x37a   :  { %622 = vst [vmem:[#allocation11 + $0x28] sm:$0xff] %v614_v25  ;;  %v589_v27 = vmul.f32 %v572_v26, %v1070_v50 }
 0x37b   :  { %620 = vst [vmem:[#allocation11 + $0x18] sm:$0xff] %v612_v24 }
 0x37c   :  { %v598_v30 = vmul.f32 %v1077_v56, %v589_v27 }
 0x37e   :  { %v607_v31 = vadd.f32 %v1081_v57, %v598_v30 }
 0x380   :  { %v615_v32 = vmax.f32 %v607_v31, 0.0 }
 0x382   :  { %623 = vst [vmem:[#allocation11 + $0x30] sm:$0xff] %v615_v32 }
 0x383   :  { %637 = dma.vmem_to_hbm [thread:$0]  %s630_s4, 1024, %s632_s19, [#allocation4], %s874_s26, %s874_s26, %s875_s27  }
 0x384   :  { %871 = dma.done.wait [#allocation4], 1024  }
 0x385   :  { %872 = vsyncadd [#allocation4], 4294966272 }
 0x386   :  { %642 = vsyncpa [#allocation3], 1 }
 0x387   :  { %643 = vsyncpa [#allocation6], 1 }
 0x388   :  { %644 = vsyncpa [#allocation9], 1 }
 0x389   :  { %645 = vsyncpa [#allocation4], 1 }

// kernel: tpu_custom_call.1
= control target key start
LH: loop header
LB: loop body
LE: loop exit
PB: predicated region body
PF: predicated region fallthrough
CT: control target
= control target key end

     0   :  { %10 = vsyncpa [#allocation3], 0  ;;  %s1136_s0 = inlined_call_operand.hbm [shape: f32[64,128], index: 0, kind: input, shape index: {}]   ;;  %s1137_s1 = inlined_call_operand.hbm [shape: f32[128,128], index: 1, kind: input, shape index: {}]   ;;  %s1138_s2 = inlined_call_operand.hbm [shape: f32[3,128], index: 2, kind: input, shape index: {}]   ;;  %s1139_s3 = inlined_call_operand.hbm [shape: f32[128,128], index: 3, kind: input, shape index: {}]   ;;  %s1140_s4 = inlined_call_operand.hbm [shape: f32[3,128], index: 4, kind: input, shape index: {}]   ;;  %s1141_s5 = inlined_call_operand.hbm [shape: f32[64,128], index: 5, kind: output, shape index: {}]  }
   0x1   :  { %11 = vsyncpa [#allocation6], 0 }
   0x2   :  { %12 = vsyncpa [#allocation9], 0 }
   0x3   :  { %13 = vsyncpa [#allocation4], 0  ;;  %s31_s20 = sshll.u32 %s1137_s1, 4  ;;  %s873_s21 = smov [#allocation5]   ;;  %s32_s20 = int_to_ptr.hbm [resolvable:$true] %s31_s20 }
   0x4   :  { %s33_s22 = sshll.u32 %s873_s21, 4  ;;  %s55_s25 = sshll.u32 %s1139_s3, 4  ;;  %s34_s22 = int_to_ptr.vmem [resolvable:$true] %s33_s22  ;;  %s56_s25 = int_to_ptr.hbm [resolvable:$true] %s55_s25 }
   0x5   :  { %s874_s26 = smov 128   ;;  %s875_s27 = smov 8  }
   0x6   :  { %39 = dma.hbm_to_vmem [thread:$0]  %s32_s20, 2048, %s34_s22, [#allocation6], %s874_s26, %s874_s26, %s875_s27  }
   0x7   :  { %s876_s28 = smov [#allocation8]   ;;  %s18_s1 = sshll.u32 %s1136_s0, 4  ;;  %s19_s1 = int_to_ptr.hbm [resolvable:$true] %s18_s1 }
   0x8   :  { %s57_s29 = sshll.u32 %s876_s28, 4  ;;  %s45_s8 = sshll.u32 %s1138_s2, 4  ;;  %s58_s29 = int_to_ptr.vmem [resolvable:$true] %s57_s29  ;;  %s46_s8 = int_to_ptr.hbm [resolvable:$true] %s45_s8 }
   0x9   :  { %63 = dma.hbm_to_vmem [thread:$0]  %s56_s25, 2048, %s58_s29, [#allocation9], %s874_s26, %s874_s26, %s875_s27  }
   0xa   :  { %s877_s9 = smov [#allocation2]   ;;  %s878_s11 = smov [#allocation7]  }
   0xb   :  { %s20_s10 = sshll.u32 %s877_s9, 4  ;;  %s47_s0 = sshll.u32 %s878_s11, 4  ;;  %s21_s10 = int_to_ptr.vmem [resolvable:$true] %s20_s10  ;;  %s48_s0 = int_to_ptr.vmem [resolvable:$true] %s47_s0 }
   0xc   :  { %26 = dma.hbm_to_vmem [thread:$0]  %s19_s1, 1024, %s21_s10, [#allocation3], %s874_s26, %s874_s26, %s875_s27  }
   0xd   :  { %s69_s14 = sshll.u32 %s1140_s4, 4  ;;  %s879_s15 = smov [#allocation10]   ;;  %s70_s14 = int_to_ptr.hbm [resolvable:$true] %s69_s14 }
   0xe   :  { %50 = dma.hbm_to_vmem [thread:$0]  %s46_s8, 64, %s48_s0, [#allocation6]  }
   0xf   :  { %s71_s16 = sshll.u32 %s879_s15, 4  ;;  %s72_s16 = int_to_ptr.vmem [resolvable:$true] %s71_s16 }
  0x10   :  { %74 = dma.hbm_to_vmem [thread:$0]  %s70_s14, 64, %s72_s16, [#allocation9]  }
  0x11   :  { %865 = dma.done.wait [#allocation3], 1024  }
  0x12   :  { %866 = vsyncadd [#allocation3], 4294966272 }
  0x13   :  { %867 = dma.done.wait [#allocation6], 2112  }
  0x14   :  { %868 = vsyncadd [#allocation6], 4294965184 }
  0x15   :  { %869 = dma.done.wait [#allocation9], 2112  }
  0x16   :  { %870 = vsyncadd [#allocation9], 4294965184  ;;  %v126_v0 = vld [vmem:[#allocation5 + $0x78] sm:$0xff]  ;;  %v125_v1 = vld [vmem:[#allocation5 + $0x70] sm:$0xff]  ;;  %v95_v42 = vlaneseq  ;;  %v880_v46 = vmov 0.0   ;;  %s881_s2 = smov [#allocation11]  }
  0x17   :  { %648 = vmatpush.msra.mxu2 %v126_v0  ;;  %129 = vmatpush.msra.mxu0 %v126_v0  ;;  %v124_v2 = vld [vmem:[#allocation5 + $0x68] sm:$0xff]  ;;  %v123_v3 = vld [vmem:[#allocation5 + $0x60] sm:$0xff]  ;;  %v122_v4 = vld [vmem:[#allocation5 + $0x58] sm:$0xff]  ;;  %s629_s4 = sshll.u32 %s881_s2, 4  ;;  %s631_s19 = sshll.u32 %s1141_s5, 4  ;;  %s630_s4 = int_to_ptr.vmem [resolvable:$true] %s629_s4  ;;  %s632_s19 = int_to_ptr.hbm [resolvable:$true] %s631_s19 }
  0x18   :  { %v121_v5 = vld [vmem:[#allocation5 + $0x50] sm:$0xff]  ;;  %v120_v6 = vld [vmem:[#allocation5 + $0x48] sm:$0xff]  ;;  %v119_v7 = vld [vmem:[#allocation5 + $0x40] sm:$0xff]  ;;  %v939_v43 = vand.u32 127, %v95_v42 }
  0x19   :  { %649 = vmatpush.msra.mxu2 %v125_v1  ;;  %130 = vmatpush.msra.mxu0 %v125_v1  ;;  %v118_v8 = vld [vmem:[#allocation5 + $0x38] sm:$0xff]  ;;  %v117_v9 = vld [vmem:[#allocation5 + $0x30] sm:$0xff]  ;;  %v116_v10 = vld [vmem:[#allocation5 + $0x28] sm:$0xff] }
  0x1a   :  { %v115_v11 = vld [vmem:[#allocation5 + $0x20] sm:$0xff]  ;;  %v114_v12 = vld [vmem:[#allocation5 + $0x18] sm:$0xff]  ;;  %v113_v13 = vld [vmem:[#allocation5 + $0x10] sm:$0xff]  ;;  %vm97_vm0 = vcmp.lt.s32.totalorder %v939_v43, 16 }
  0x1b   :  { %650 = vmatpush.msra.mxu2 %v124_v2  ;;  %131 = vmatpush.msra.mxu0 %v124_v2  ;;  %v112_v14 = vld [vmem:[#allocation5 + $0x8] sm:$0xff]  ;;  %v111_v15 = vld [vmem:[#allocation5] sm:$0xff]  ;;  %v109_v20 = vld [vmem:[#allocation2 + $0x30] sm:$0xff]  ;;  %v646_v47 = vsel %vm97_vm0, 1.0, %v880_v46 }
  0x1c   :  { %v107_v16 = vld [vmem:[#allocation2 + $0x20] sm:$0xff]  ;;  %v108_v18 = vld [vmem:[#allocation2 + $0x28] sm:$0xff]  ;;  %v105_v21 = vld [vmem:[#allocation2 + $0x10] sm:$0xff] }
  0x1d   :  { %651 = vmatpush.msra.mxu2 %v123_v3  ;;  %132 = vmatpush.msra.mxu0 %v123_v3  ;;  %v103_v17 = vld [vmem:[#allocation2] sm:$0xff]  ;;  %v104_v19 = vld [vmem:[#allocation2 + $0x8] sm:$0xff]  ;;  %v110_v22 = vld [vmem:[#allocation2 + $0x38] sm:$0xff] }
  0x1e   :  { %v106_v23 = vld [vmem:[#allocation2 + $0x18] sm:$0xff]  ;;  %v936_v24 = vld [vmem:[#allocation7] sm:$0x7] }
  0x1f   :  { %652 = vmatpush.msra.mxu2 %v122_v4  ;;  %133 = vmatpush.msra.mxu0 %v122_v4  ;;  %v128_v26 = vperm.slane %v936_v24, 0  ;;  %v379_v48 = vld [vmem:[#allocation8 + $0x78] sm:$0xff] }
  0x20   :  { %664 = vmatpush.msra.mxu3 %v379_v48  ;;  %382 = vmatpush.msra.mxu1 %v379_v48 }
  0x21   :  { %653 = vmatpush.msra.mxu2 %v121_v5  ;;  %134 = vmatpush.msra.mxu0 %v121_v5 }
  0x23   :  { %654 = vmatpush.msra.mxu2 %v120_v6  ;;  %135 = vmatpush.msra.mxu0 %v120_v6 }
  0x25   :  { %655 = vmatpush.msra.mxu2 %v119_v7  ;;  %136 = vmatpush.msra.mxu0 %v119_v7 }
  0x27   :  { %656 = vmatpush.msra.mxu2 %v118_v8  ;;  %137 = vmatpush.msra.mxu0 %v118_v8 }
  0x29   :  { %657 = vmatpush.msra.mxu2 %v117_v9  ;;  %138 = vmatpush.msra.mxu0 %v117_v9 }
  0x2b   :  { %658 = vmatpush.msra.mxu2 %v116_v10  ;;  %139 = vmatpush.msra.mxu0 %v116_v10 }
  0x2d   :  { %659 = vmatpush.msra.mxu2 %v115_v11  ;;  %140 = vmatpush.msra.mxu0 %v115_v11 }
  0x2f   :  { %660 = vmatpush.msra.mxu2 %v114_v12  ;;  %141 = vmatpush.msra.mxu0 %v114_v12 }
  0x31   :  { %661 = vmatpush.msra.mxu2 %v113_v13  ;;  %142 = vmatpush.msra.mxu0 %v113_v13 }
  0x33   :  { %662 = vmatpush.msra.mxu2 %v112_v14  ;;  %143 = vmatpush.msra.mxu0 %v112_v14 }
  0x35   :  { %663 = vmatpush.msra.mxu2 %v111_v15  ;;  %144 = vmatpush.msra.mxu0 %v111_v15 }
  0x36   :  { %157 = vmatmul.f32.vlgmr.msra.gmra.mxu2 %v107_v16  ;;  %145 = vmatmul.f32.vlgmr.msra.gmra.mxu0 %v103_v17 }
  0x3e   :  { %160 = vmatmul.f32.gmra.mxu2 %v108_v18  ;;  %148 = vmatmul.f32.gmra.mxu0 %v104_v19 }
  0x46   :  { %163 = vmatmul.f32.gmra.mxu2 %v109_v20  ;;  %151 = vmatmul.f32.gmra.mxu0 %v105_v21 }
  0x4e   :  { %166 = vmatmul.f32.gmra.mxu2 %v110_v22  ;;  %154 = vmatmul.f32.gmra.mxu0 %v106_v23  ;;  %v378_v23 = vld [vmem:[#allocation8 + $0x70] sm:$0xff] }
  0x4f   :  { %665 = vmatpush.msra.mxu3 %v378_v23  ;;  %383 = vmatpush.msra.mxu1 %v378_v23 }
  0xb3   :  { %v146_v25 = vpop.f32.mrf.mxu0 }
  0xb4   :  { %v147_v30 = vadd.f32 %v146_v25, %v128_v26  ;;  %v377_v25 = vld [vmem:[#allocation8 + $0x68] sm:$0xff] }
  0xb5   :  { %666 = vmatpush.msra.mxu3 %v377_v25  ;;  %384 = vmatpush.msra.mxu1 %v377_v25 }
  0xb9   :  { %v158_v27 = vpop.f32.mrf.mxu2 }
  0xba   :  { %v159_v28 = vadd.f32 %v158_v27, %v128_v26  ;;  %v375_v27 = vld [vmem:[#allocation8 + $0x58] sm:$0xff] }
  0xbb   :  { %v149_v29 = vpop.f32.mrf.mxu0 }
  0xbc   :  { %178 = vadd.xlane.f32.xlu0 %v159_v28  ;;  %v150_v34 = vadd.f32 %v149_v29, %v128_v26  ;;  %v373_v29 = vld [vmem:[#allocation8 + $0x48] sm:$0xff] }
  0xc1   :  { %v161_v31 = vpop.f32.mrf.mxu2 }
  0xc2   :  { %v162_v32 = vadd.f32 %v161_v31, %v128_v26  ;;  %v371_v31 = vld [vmem:[#allocation8 + $0x38] sm:$0xff] }
  0xc3   :  { %v152_v33 = vpop.f32.mrf.mxu0 }
  0xc4   :  { %180 = vadd.xlane.f32.xlu1 %v162_v32  ;;  %170 = vadd.xlane.f32.xlu0 %v147_v30  ;;  %v153_v38 = vadd.f32 %v152_v33, %v128_v26  ;;  %v369_v33 = vld [vmem:[#allocation8 + $0x28] sm:$0xff] }
  0xc9   :  { %v164_v35 = vpop.f32.mrf.mxu2 }
  0xca   :  { %v165_v36 = vadd.f32 %v164_v35, %v128_v26  ;;  %v367_v35 = vld [vmem:[#allocation8 + $0x18] sm:$0xff] }
  0xcb   :  { %v155_v37 = vpop.f32.mrf.mxu0 }
  0xcc   :  { %182 = vadd.xlane.f32.xlu2 %v165_v36  ;;  %172 = vadd.xlane.f32.xlu1 %v150_v34  ;;  %v156_v39 = vadd.f32 %v155_v37, %v128_v26  ;;  %v365_v37 = vld [vmem:[#allocation8 + $0x8] sm:$0xff] }
  0xd1   :  { %v167_v40 = vpop.f32.mrf.mxu2 }
  0xd2   :  { %v168_v41 = vadd.f32 %v167_v40, %v128_v26  ;;  %v376_v26 = vld [vmem:[#allocation8 + $0x60] sm:$0xff] }
  0xd3   :  { %667 = vmatpush.msra.mxu3 %v376_v26  ;;  %385 = vmatpush.msra.mxu1 %v376_v26 }
  0xd4   :  { %174 = vadd.xlane.f32.xlu2 %v153_v38  ;;  %176 = vadd.xlane.f32.xlu1 %v156_v39 }
  0xd5   :  { %184 = vadd.xlane.f32.xlu0 %v168_v41  ;;  %668 = vmatpush.msra.mxu3 %v375_v27 }
  0xd6   :  { %386 = vmatpush.msra.mxu1 %v375_v27 }
 0x12f   :  { %v179_v44 = vpop.xlane.xlu0 %178 }
 0x130   :  { %v190_v45 = vmul.f32 0.0625, %v179_v44 }
 0x132   :  { %v198_v49 = vsub.f32 %v159_v28, %v190_v45  ;;  %v374_v28 = vld [vmem:[#allocation8 + $0x50] sm:$0xff] }
 0x133   :  { %669 = vmatpush.msra.mxu3 %v374_v28  ;;  %387 = vmatpush.msra.mxu1 %v374_v28 }
 0x134   :  { %v943_v50 = vmul.f32 %v646_v47, %v198_v49 }
 0x135   :  { %670 = vmatpush.msra.mxu3 %v373_v29  ;;  %388 = vmatpush.msra.mxu1 %v373_v29 }
 0x136   :  { %v214_v51 = vmul.f32 %v943_v50, %v943_v50 }
 0x137   :  { %v181_v52 = vpop.xlane.xlu1 %180  ;;  %v171_v53 = vpop.xlane.xlu0 %170 }
 0x138   :  { %v191_v54 = vmul.f32 0.0625, %v181_v52  ;;  %v186_v55 = vmul.f32 0.0625, %v171_v53  ;;  %226 = vadd.xlane.f32.xlu2 %v214_v51 }
 0x13a   :  { %v199_v56 = vsub.f32 %v162_v32, %v191_v54  ;;  %v194_v57 = vsub.f32 %v147_v30, %v186_v55  ;;  %v372_v30 = vld [vmem:[#allocation8 + $0x40] sm:$0xff]  ;;  %v370_v32 = vld [vmem:[#allocation8 + $0x30] sm:$0xff] }
 0x13b   :  { %671 = vmatpush.msra.mxu3 %v372_v30  ;;  %389 = vmatpush.msra.mxu1 %v372_v30 }
 0x13c   :  { %v947_v58 = vmul.f32 %v646_v47, %v199_v56  ;;  %v949_v59 = vmul.f32 %v646_v47, %v194_v57 }
 0x13d   :  { %672 = vmatpush.msra.mxu3 %v371_v31  ;;  %390 = vmatpush.msra.mxu1 %v371_v31 }
 0x13e   :  { %v215_v60 = vmul.f32 %v947_v58, %v947_v58  ;;  %v210_v61 = vmul.f32 %v949_v59, %v949_v59 }
 0x13f   :  { %v183_v62 = vpop.xlane.xlu2 %182  ;;  %v173_v63 = vpop.xlane.xlu1 %172  ;;  %673 = vmatpush.msra.mxu3 %v370_v32  ;;  %391 = vmatpush.msra.mxu1 %v370_v32 }
 0x140   :  { %v192_v0 = vmul.f32 0.0625, %v183_v62  ;;  %v187_v1 = vmul.f32 0.0625, %v173_v63  ;;  %228 = vadd.xlane.f32.xlu1 %v215_v60  ;;  %218 = vadd.xlane.f32.xlu0 %v210_v61 }
 0x141   :  { %674 = vmatpush.msra.mxu3 %v369_v33  ;;  %392 = vmatpush.msra.mxu1 %v369_v33 }
 0x142   :  { %v200_v2 = vsub.f32 %v165_v36, %v192_v0  ;;  %v195_v3 = vsub.f32 %v150_v34, %v187_v1  ;;  %v368_v34 = vld [vmem:[#allocation8 + $0x20] sm:$0xff]  ;;  %v366_v36 = vld [vmem:[#allocation8 + $0x10] sm:$0xff] }
 0x143   :  { %675 = vmatpush.msra.mxu3 %v368_v34  ;;  %393 = vmatpush.msra.mxu1 %v368_v34 }
 0x144   :  { %v955_v4 = vmul.f32 %v646_v47, %v195_v3  ;;  %v957_v5 = vmul.f32 %v646_v47, %v200_v2 }
 0x145   :  { %676 = vmatpush.msra.mxu3 %v367_v35  ;;  %394 = vmatpush.msra.mxu1 %v367_v35 }
 0x146   :  { %v211_v6 = vmul.f32 %v955_v4, %v955_v4  ;;  %v216_v7 = vmul.f32 %v957_v5, %v957_v5 }
 0x147   :  { %v175_v8 = vpop.xlane.xlu2 %174  ;;  %v177_v9 = vpop.xlane.xlu1 %176  ;;  %677 = vmatpush.msra.mxu3 %v366_v36  ;;  %395 = vmatpush.msra.mxu1 %v366_v36 }
 0x148   :  { %v188_v10 = vmul.f32 0.0625, %v175_v8  ;;  %v189_v11 = vmul.f32 0.0625, %v177_v9  ;;  %v185_v12 = vpop.xlane.xlu0 %184  ;;  %220 = vadd.xlane.f32.xlu2 %v211_v6  ;;  %230 = vadd.xlane.f32.xlu0 %v216_v7  ;;  %v981_v7 = vperm.slane %v936_v24, 1 }
 0x149   :  { %v193_v13 = vmul.f32 0.0625, %v185_v12  ;;  %678 = vmatpush.msra.mxu3 %v365_v37  ;;  %396 = vmatpush.msra.mxu1 %v365_v37  ;;  %v986_v12 = vperm.slane %v936_v24, 2 }
 0x14a   :  { %v196_v14 = vsub.f32 %v153_v38, %v188_v10  ;;  %v197_v15 = vsub.f32 %v156_v39, %v189_v11  ;;  %v364_v38 = vld [vmem:[#allocation8] sm:$0xff] }
 0x14b   :  { %v201_v16 = vsub.f32 %v168_v41, %v193_v13  ;;  %679 = vmatpush.msra.mxu3 %v364_v38  ;;  %397 = vmatpush.msra.mxu1 %v364_v38 }
 0x14c   :  { %v963_v17 = vmul.f32 %v646_v47, %v196_v14  ;;  %v965_v18 = vmul.f32 %v646_v47, %v197_v15 }
 0x14d   :  { %v967_v19 = vmul.f32 %v646_v47, %v201_v16 }
 0x14e   :  { %v212_v20 = vmul.f32 %v963_v17, %v963_v17  ;;  %v213_v21 = vmul.f32 %v965_v18, %v965_v18 }
 0x14f   :  { %v217_v22 = vmul.f32 %v967_v19, %v967_v19 }
 0x150   :  { %222 = vadd.xlane.f32.xlu1 %v212_v20  ;;  %224 = vadd.xlane.f32.xlu0 %v213_v21 }
 0x151   :  { %232 = vadd.xlane.f32.xlu2 %v217_v22 }
 0x1ab   :  { %v227_v39 = vpop.xlane.xlu2 %226 }
 0x1ac   :  { %v238_v40 = vmul.f32 0.0625, %v227_v39 }
 0x1ae   :  { %v246_v41 = vadd.f32 1e-05, %v238_v40 }
 0x1b0   :  { %689 = vrsqrt.f32 %v246_v41  ;;  %vm296_vm2 = vweird.f32 %v246_v41 }
 0x1b3   :  { %v229_v42 = vpop.xlane.xlu1 %228  ;;  %v219_v44 = vpop.xlane.xlu0 %218 }
 0x1b4   :  { %v239_v45 = vmul.f32 0.0625, %v229_v42  ;;  %v234_v47 = vmul.f32 0.0625, %v219_v44 }
 0x1b6   :  { %v690_v48 = vpop.eup %689  ;;  %v247_v49 = vadd.f32 1e-05, %v239_v45  ;;  %v242_v51 = vadd.f32 1e-05, %v234_v47 }
 0x1b7   :  { %v291_v52 = vmul.f32 %v690_v48, %v246_v41  ;;  %vm297_vm1 = vweird.f32 %v690_v48 }
 0x1b8   :  { %691 = vrsqrt.f32 %v247_v49  ;;  %vm298_vm3 = vmor %vm296_vm2, %vm297_vm1  ;;  %vm306_vm6 = vweird.f32 %v247_v49  ;;  %vm256_vm8 = vweird.f32 %v242_v51 }
 0x1b9   :  { %v292_v53 = vmul.f32 %v690_v48, %v291_v52  ;;  %693 = vrsqrt.f32 %v242_v51 }
 0x1bb   :  { %v293_v54 = vmul.f32 0.5, %v292_v53  ;;  %v221_v55 = vpop.xlane.xlu2 %220  ;;  %v231_v56 = vpop.xlane.xlu0 %230 }
 0x1bc   :  { %v235_v57 = vmul.f32 0.0625, %v221_v55  ;;  %v240_v60 = vmul.f32 0.0625, %v231_v56 }
 0x1bd   :  { %v294_v61 = vsub.f32 1.5, %v293_v54 }
 0x1be   :  { %v692_v62 = vpop.eup %691  ;;  %v975_v63 = vadd.f32 1e-05, %v235_v57  ;;  %v977_v0 = vadd.f32 1e-05, %v240_v60 }
 0x1bf   :  { %v694_v1 = vpop.eup %693  ;;  %v295_v2 = vmul.f32 %v690_v48, %v294_v61  ;;  %v301_v3 = vmul.f32 %v692_v62, %v247_v49  ;;  %vm307_vm4 = vweird.f32 %v692_v62 }
 0x1c0   :  { %v251_v6 = vmul.f32 %v694_v1, %v242_v51  ;;  %695 = vrsqrt.f32 %v975_v63  ;;  %vm257_vm5 = vweird.f32 %v694_v1  ;;  %vm308_vm7 = vmor %vm306_vm6, %vm307_vm4  ;;  %vm266_vm12 = vweird.f32 %v975_v63 }
 0x1c1   :  { %v302_v8 = vmul.f32 %v692_v62, %v301_v3  ;;  %697 = vrsqrt.f32 %v977_v0  ;;  %v299_v9 = vsel %vm298_vm3, %v690_v48, %v295_v2  ;;  %vm258_vm9 = vmor %vm256_vm8, %vm257_vm5  ;;  %vm316_vm14 = vweird.f32 %v977_v0 }
 0x1c2   :  { %v252_v10 = vmul.f32 %v694_v1, %v251_v6  ;;  %v334_v11 = vmul.f32 %v299_v9, %v943_v50 }
 0x1c3   :  { %v303_v13 = vmul.f32 0.5, %v302_v8  ;;  %v223_v14 = vpop.xlane.xlu1 %222  ;;  %v225_v15 = vpop.xlane.xlu0 %224 }
 0x1c4   :  { %v253_v16 = vmul.f32 0.5, %v252_v10  ;;  %v236_v20 = vmul.f32 0.0625, %v223_v14  ;;  %v233_v21 = vpop.xlane.xlu2 %232  ;;  %v237_v22 = vmul.f32 0.0625, %v225_v15  ;;  %v343_v23 = vmul.f32 %v981_v7, %v334_v11 }
 0x1c5   :  { %v304_v25 = vsub.f32 1.5, %v303_v13  ;;  %v241_v26 = vmul.f32 0.0625, %v233_v21 }
 0x1c6   :  { %v696_v27 = vpop.eup %695  ;;  %v254_v28 = vsub.f32 1.5, %v253_v16  ;;  %v989_v29 = vadd.f32 1e-05, %v236_v20  ;;  %v991_v50 = vadd.f32 1e-05, %v237_v22  ;;  %v352_v24 = vadd.f32 %v986_v12, %v343_v23 }
 0x1c7   :  { %v698_v30 = vpop.eup %697  ;;  %v305_v31 = vmul.f32 %v692_v62, %v304_v25  ;;  %v261_v32 = vmul.f32 %v696_v27, %v975_v63  ;;  %v995_v33 = vadd.f32 1e-05, %v241_v26  ;;  %vm267_vm10 = vweird.f32 %v696_v27 }
 0x1c8   :  { %v255_v34 = vmul.f32 %v694_v1, %v254_v28  ;;  %v311_v35 = vmul.f32 %v698_v30, %v977_v0  ;;  %699 = vrsqrt.f32 %v989_v29  ;;  %v360_v38 = vmax.f32 %v352_v24, 0.0  ;;  %vm1008_vm13 = vmor %vm266_vm12, %vm267_vm10 }
 0x1c9   :  { %v262_v36 = vmul.f32 %v696_v27, %v261_v32  ;;  %701 = vrsqrt.f32 %v995_v33  ;;  %v309_v41 = vsel %vm308_vm7, %v692_v62, %v305_v31  ;;  %vm317_vm11 = vweird.f32 %v698_v30 }
 0x1ca   :  { %v312_v37 = vmul.f32 %v698_v30, %v311_v35  ;;  %703 = vrsqrt.f32 %v991_v50  ;;  %v259_v40 = vsel %vm258_vm9, %v694_v1, %v255_v34  ;;  %410 = vmatmul.f32.vlgmr.msra.gmra.mxu3 %v360_v38  ;;  %v335_v45 = vmul.f32 %v309_v41, %v947_v58  ;;  %vm318_vm15 = vmor %vm316_vm14, %vm317_vm11 }
 0x1cb   :  { %v263_v39 = vmul.f32 0.5, %v262_v36  ;;  %v330_v44 = vmul.f32 %v259_v40, %v949_v59  ;;  %vm276_vm1 = vweird.f32 %v989_v29  ;;  %vm326_vm5 = vweird.f32 %v995_v33  ;;  %v1037_v40 = vld [vmem:[#allocation10] sm:$0x7] }
 0x1cc   :  { %v313_v42 = vmul.f32 0.5, %v312_v37  ;;  %v344_v52 = vmul.f32 %v981_v7, %v335_v45  ;;  %vm286_vm7 = vweird.f32 %v991_v50  ;;  %vm100_vm9 = vcmp.lt.s32.totalorder %v939_v43, 32 }
 0x1cd   :  { %v264_v47 = vsub.f32 1.5, %v263_v39  ;;  %v339_v51 = vmul.f32 %v981_v7, %v330_v44 }
 0x1ce   :  { %v700_v48 = vpop.eup %699  ;;  %v314_v49 = vsub.f32 1.5, %v313_v42  ;;  %v353_v63 = vadd.f32 %v986_v12, %v344_v52  ;;  %v381_v42 = vperm.slane %v1037_v40, 0 }
 0x1cf   :  { %v702_v53 = vpop.eup %701  ;;  %v265_v54 = vmul.f32 %v696_v27, %v264_v47  ;;  %v271_v55 = vmul.f32 %v700_v48, %v989_v29  ;;  %v348_v60 = vadd.f32 %v986_v12, %v339_v51  ;;  %vm277_vm0 = vweird.f32 %v700_v48 }
 0x1d0   :  { %v704_v56 = vpop.eup %703  ;;  %v315_v58 = vmul.f32 %v698_v30, %v314_v49  ;;  %v321_v57 = vmul.f32 %v702_v53, %v995_v33  ;;  %v361_v10 = vmax.f32 %v353_v63, 0.0  ;;  %vm327_vm2 = vweird.f32 %v702_v53  ;;  %vm278_vm4 = vmor %vm276_vm1, %vm277_vm0 }
 0x1d1   :  { %v272_v61 = vmul.f32 %v700_v48, %v271_v55  ;;  %v281_v62 = vmul.f32 %v704_v56, %v991_v50  ;;  %v356_v2 = vmax.f32 %v348_v60, 0.0  ;;  %v269_v3 = vsel %vm1008_vm13, %v696_v27, %v265_v54  ;;  %vm328_vm6 = vmor %vm326_vm5, %vm327_vm2 }
 0x1d2   :  { %v322_v1 = vmul.f32 %v702_v53, %v321_v57  ;;  %v319_v6 = vsel %vm318_vm15, %v698_v30, %v315_v58  ;;  %v331_v0 = vmul.f32 %v269_v3, %v955_v4  ;;  %413 = vmatmul.f32.gmra.mxu3 %v361_v10  ;;  %vm287_vm3 = vweird.f32 %v704_v56 }
 0x1d3   :  { %v273_v8 = vmul.f32 0.5, %v272_v61  ;;  %v282_v9 = vmul.f32 %v704_v56, %v281_v62  ;;  %398 = vmatmul.f32.vlgmr.msra.gmra.mxu1 %v356_v2  ;;  %v336_v13 = vmul.f32 %v319_v6, %v957_v5  ;;  %vm288_vm8 = vmor %vm286_vm7, %vm287_vm3  ;;  %v647_v60 = vsel %vm100_vm9, 1.0, %v880_v46 }
 0x1d4   :  { %v323_v11 = vmul.f32 0.5, %v322_v1  ;;  %v340_v16 = vmul.f32 %v981_v7, %v331_v0 }
 0x1d5   :  { %v274_v14 = vsub.f32 1.5, %v273_v8  ;;  %v283_v15 = vmul.f32 0.5, %v282_v9  ;;  %v345_v21 = vmul.f32 %v981_v7, %v336_v13 }
 0x1d6   :  { %v324_v20 = vsub.f32 1.5, %v323_v11  ;;  %v349_v4 = vadd.f32 %v986_v12, %v340_v16 }
 0x1d7   :  { %v275_v22 = vmul.f32 %v700_v48, %v274_v14  ;;  %v284_v23 = vsub.f32 1.5, %v283_v15  ;;  %v354_v5 = vadd.f32 %v986_v12, %v345_v21 }
 0x1d8   :  { %v325_v25 = vmul.f32 %v702_v53, %v324_v20  ;;  %v357_v27 = vmax.f32 %v349_v4, 0.0 }
 0x1d9   :  { %v285_v26 = vmul.f32 %v704_v56, %v284_v23  ;;  %v279_v28 = vsel %vm278_vm4, %v700_v48, %v275_v22  ;;  %v362_v29 = vmax.f32 %v354_v5, 0.0 }
 0x1da   :  { %v332_v24 = vmul.f32 %v279_v28, %v963_v17  ;;  %v329_v30 = vsel %vm328_vm6, %v702_v53, %v325_v25 }
 0x1db   :  { %v337_v31 = vmul.f32 %v329_v30, %v967_v19  ;;  %v289_v32 = vsel %vm288_vm8, %v704_v56, %v285_v26  ;;  %401 = vmatmul.f32.gmra.mxu1 %v357_v27  ;;  %416 = vmatmul.f32.gmra.mxu3 %v362_v29 }
 0x1dc   :  { %v341_v34 = vmul.f32 %v981_v7, %v332_v24  ;;  %v333_v50 = vmul.f32 %v289_v32, %v965_v18 }
 0x1dd   :  { %v346_v33 = vmul.f32 %v981_v7, %v337_v31 }
 0x1de   :  { %v350_v35 = vadd.f32 %v986_v12, %v341_v34  ;;  %v342_v17 = vmul.f32 %v981_v7, %v333_v50 }
 0x1df   :  { %v355_v36 = vadd.f32 %v986_v12, %v346_v33 }
 0x1e0   :  { %v358_v37 = vmax.f32 %v350_v35, 0.0  ;;  %v351_v19 = vadd.f32 %v986_v12, %v342_v17 }
 0x1e1   :  { %v363_v38 = vmax.f32 %v355_v36, 0.0 }
 0x1e2   :  { %v359_v39 = vmax.f32 %v351_v19, 0.0 }
 0x1e3   :  { %404 = vmatmul.f32.gmra.mxu1 %v358_v37  ;;  %419 = vmatmul.f32.gmra.mxu3 %v363_v38 }
 0x1eb   :  { %407 = vmatmul.f32.gmra.mxu1 %v359_v39 }
 0x24d   :  { %v411_v41 = vpop.f32.mrf.mxu3 }
 0x24e   :  { %v412_v51 = vadd.f32 %v411_v41, %v381_v42 }
 0x250   :  { %v399_v44 = vpop.f32.mrf.mxu1 }
 0x251   :  { %v400_v45 = vadd.f32 %v399_v44, %v381_v42 }
 0x253   :  { %423 = vadd.xlane.f32.xlu1 %v400_v45 }
 0x255   :  { %v414_v18 = vpop.f32.mrf.mxu3 }
 0x256   :  { %v415_v54 = vadd.f32 %v414_v18, %v381_v42 }
 0x258   :  { %v402_v47 = vpop.f32.mrf.mxu1 }
 0x259   :  { %v403_v48 = vadd.f32 %v402_v47, %v381_v42 }
 0x25b   :  { %425 = vadd.xlane.f32.xlu2 %v403_v48 }
 0x25e   :  { %v417_v49 = vpop.f32.mrf.mxu3 }
 0x25f   :  { %v418_v59 = vadd.f32 %v417_v49, %v381_v42 }
 0x260   :  { %v405_v7 = vpop.f32.mrf.mxu1 }
 0x261   :  { %v406_v52 = vadd.f32 %v405_v7, %v381_v42 }
 0x263   :  { %427 = vadd.xlane.f32.xlu0 %v406_v52  ;;  %431 = vadd.xlane.f32.xlu2 %v412_v51 }
 0x266   :  { %v420_v12 = vpop.f32.mrf.mxu3 }
 0x267   :  { %v421_v55 = vadd.f32 %v420_v12, %v381_v42 }
 0x268   :  { %v408_v53 = vpop.f32.mrf.mxu1 }
 0x269   :  { %v409_v56 = vadd.f32 %v408_v53, %v381_v42 }
 0x26b   :  { %433 = vadd.xlane.f32.xlu0 %v415_v54  ;;  %437 = vadd.xlane.f32.xlu2 %v421_v55 }
 0x26c   :  { %429 = vadd.xlane.f32.xlu1 %v409_v56 }
 0x274   :  { %435 = vadd.xlane.f32.xlu1 %v418_v59 }
 0x2c6   :  { %v424_v58 = vpop.xlane.xlu1 %423 }
 0x2c7   :  { %v439_v57 = vmul.f32 0.03125, %v424_v58 }
 0x2c9   :  { %v447_v61 = vsub.f32 %v400_v45, %v439_v57  ;;  %v1081_v57 = vperm.slane %v1037_v40, 2 }
 0x2cb   :  { %v1042_v62 = vmul.f32 %v647_v60, %v447_v61 }
 0x2cd   :  { %v463_v63 = vmul.f32 %v1042_v62, %v1042_v62 }
 0x2ce   :  { %v426_v1 = vpop.xlane.xlu2 %425 }
 0x2cf   :  { %v440_v2 = vmul.f32 0.03125, %v426_v1  ;;  %471 = vadd.xlane.f32.xlu0 %v463_v63 }
 0x2d1   :  { %v448_v3 = vsub.f32 %v403_v48, %v440_v2 }
 0x2d3   :  { %v1046_v6 = vmul.f32 %v647_v60, %v448_v3 }
 0x2d5   :  { %v464_v8 = vmul.f32 %v1046_v6, %v1046_v6 }
 0x2d6   :  { %v432_v43 = vpop.xlane.xlu2 %431  ;;  %v428_v9 = vpop.xlane.xlu0 %427 }
 0x2d7   :  { %v443_v10 = vmul.f32 0.03125, %v432_v43  ;;  %v441_v0 = vmul.f32 0.03125, %v428_v9  ;;  %473 = vadd.xlane.f32.xlu1 %v464_v8 }
 0x2d9   :  { %v451_v46 = vsub.f32 %v412_v51, %v443_v10  ;;  %v449_v11 = vsub.f32 %v406_v52, %v441_v0 }
 0x2db   :  { %v1050_v13 = vmul.f32 %v647_v60, %v451_v46  ;;  %v1052_v14 = vmul.f32 %v647_v60, %v449_v11 }
 0x2dd   :  { %v467_v15 = vmul.f32 %v1050_v13, %v1050_v13  ;;  %v465_v16 = vmul.f32 %v1052_v14, %v1052_v14 }
 0x2de   :  { %v438_v20 = vpop.xlane.xlu2 %437  ;;  %v434_v21 = vpop.xlane.xlu0 %433 }
 0x2df   :  { %v446_v22 = vmul.f32 0.03125, %v438_v20  ;;  %v430_v23 = vpop.xlane.xlu1 %429  ;;  %v444_v4 = vmul.f32 0.03125, %v434_v21  ;;  %479 = vadd.xlane.f32.xlu1 %v467_v15  ;;  %475 = vadd.xlane.f32.xlu2 %v465_v16 }
 0x2e0   :  { %v442_v25 = vmul.f32 0.03125, %v430_v23 }
 0x2e1   :  { %v454_v5 = vsub.f32 %v421_v55, %v446_v22  ;;  %v452_v26 = vsub.f32 %v415_v54, %v444_v4 }
 0x2e2   :  { %v450_v27 = vsub.f32 %v409_v56, %v442_v25  ;;  %v1077_v56 = vperm.slane %v1037_v40, 1 }
 0x2e3   :  { %v1058_v28 = vmul.f32 %v647_v60, %v454_v5  ;;  %v1060_v29 = vmul.f32 %v647_v60, %v452_v26 }
 0x2e4   :  { %v1062_v24 = vmul.f32 %v647_v60, %v450_v27 }
 0x2e5   :  { %v470_v30 = vmul.f32 %v1058_v28, %v1058_v28  ;;  %v468_v31 = vmul.f32 %v1060_v29, %v1060_v29 }
 0x2e6   :  { %v466_v32 = vmul.f32 %v1062_v24, %v1062_v24 }
 0x2e7   :  { %v436_v34 = vpop.xlane.xlu1 %435  ;;  %485 = vadd.xlane.f32.xlu1 %v470_v30  ;;  %481 = vadd.xlane.f32.xlu2 %v468_v31 }
 0x2e8   :  { %v445_v33 = vmul.f32 0.03125, %v436_v34  ;;  %477 = vadd.xlane.f32.xlu0 %v466_v32 }
 0x2ea   :  { %v453_v35 = vsub.f32 %v418_v59, %v445_v33 }
 0x2ec   :  { %v1070_v50 = vmul.f32 %v647_v60, %v453_v35 }
 0x2ee   :  { %v469_v36 = vmul.f32 %v1070_v50, %v1070_v50 }
 0x2f0   :  { %483 = vadd.xlane.f32.xlu0 %v469_v36 }
 0x342   :  { %v472_v37 = vpop.xlane.xlu0 %471 }
 0x343   :  { %v487_v38 = vmul.f32 0.03125, %v472_v37 }
 0x345   :  { %v495_v17 = vadd.f32 1e-05, %v487_v38 }
 0x347   :  { %705 = vrsqrt.f32 %v495_v17  ;;  %vm509_vm11 = vweird.f32 %v495_v17 }
 0x34a   :  { %v474_v19 = vpop.xlane.xlu1 %473 }
 0x34b   :  { %v488_v39 = vmul.f32 0.03125, %v474_v19 }
 0x34d   :  { %v706_v41 = vpop.eup %705  ;;  %v496_v42 = vadd.f32 1e-05, %v488_v39 }
 0x34e   :  { %v504_v44 = vmul.f32 %v706_v41, %v495_v17  ;;  %vm510_vm10 = vweird.f32 %v706_v41 }
 0x34f   :  { %707 = vrsqrt.f32 %v496_v42  ;;  %vm511_vm12 = vmor %vm509_vm11, %vm510_vm10  ;;  %vm519_vm14 = vweird.f32 %v496_v42 }
 0x350   :  { %v505_v45 = vmul.f32 %v706_v41, %v504_v44 }
 0x352   :  { %v506_v18 = vmul.f32 0.5, %v505_v45  ;;  %v480_v47 = vpop.xlane.xlu1 %479  ;;  %v476_v48 = vpop.xlane.xlu2 %475 }
 0x353   :  { %v491_v49 = vmul.f32 0.03125, %v480_v47  ;;  %v489_v7 = vmul.f32 0.03125, %v476_v48 }
 0x354   :  { %v507_v51 = vsub.f32 1.5, %v506_v18 }
 0x355   :  { %v708_v52 = vpop.eup %707  ;;  %v499_v12 = vadd.f32 1e-05, %v491_v49  ;;  %v1074_v53 = vadd.f32 1e-05, %v489_v7 }
 0x356   :  { %v508_v54 = vmul.f32 %v706_v41, %v507_v51  ;;  %v514_v55 = vmul.f32 %v708_v52, %v496_v42  ;;  %vm520_vm13 = vweird.f32 %v708_v52 }
 0x357   :  { %709 = vrsqrt.f32 %v499_v12  ;;  %vm521_vm15 = vmor %vm519_vm14, %vm520_vm13  ;;  %vm549_vm2 = vweird.f32 %v499_v12  ;;  %vm529_vm4 = vweird.f32 %v1074_v53 }
 0x358   :  { %v512_v59 = vsel %vm511_vm12, %v706_v41, %v508_v54  ;;  %v515_v58 = vmul.f32 %v708_v52, %v514_v55  ;;  %711 = vrsqrt.f32 %v1074_v53 }
 0x359   :  { %v583_v60 = vmul.f32 %v512_v59, %v1042_v62 }
 0x35a   :  { %v516_v61 = vmul.f32 0.5, %v515_v58  ;;  %v486_v63 = vpop.xlane.xlu1 %485  ;;  %v482_v1 = vpop.xlane.xlu2 %481 }
 0x35b   :  { %v592_v2 = vmul.f32 %v1077_v56, %v583_v60  ;;  %v494_v3 = vmul.f32 0.03125, %v486_v63  ;;  %v492_v8 = vmul.f32 0.03125, %v482_v1  ;;  %v478_v43 = vpop.xlane.xlu0 %477 }
 0x35c   :  { %v517_v9 = vsub.f32 1.5, %v516_v61  ;;  %v490_v10 = vmul.f32 0.03125, %v478_v43 }
 0x35d   :  { %v710_v0 = vpop.eup %709  ;;  %v601_v46 = vadd.f32 %v1081_v57, %v592_v2  ;;  %v1086_v11 = vadd.f32 1e-05, %v494_v3  ;;  %v1088_v40 = vadd.f32 1e-05, %v492_v8 }
 0x35e   :  { %v712_v15 = vpop.eup %711  ;;  %v518_v62 = vmul.f32 %v708_v52, %v517_v9  ;;  %v544_v16 = vmul.f32 %v710_v0, %v499_v12  ;;  %v1090_v20 = vadd.f32 1e-05, %v490_v10  ;;  %vm550_vm0 = vweird.f32 %v710_v0 }
 0x35f   :  { %v609_v21 = vmax.f32 %v601_v46, 0.0  ;;  %v524_v22 = vmul.f32 %v712_v15, %v1074_v53  ;;  %713 = vrsqrt.f32 %v1086_v11  ;;  %vm530_vm1 = vweird.f32 %v712_v15  ;;  %vm551_vm3 = vmor %vm549_vm2, %vm550_vm0 }
 0x360   :  { %v522_v23 = vsel %vm521_vm15, %v708_v52, %v518_v62  ;;  %v545_v4 = vmul.f32 %v710_v0, %v544_v16  ;;  %715 = vrsqrt.f32 %v1088_v40  ;;  %vm531_vm5 = vmor %vm529_vm4, %vm530_vm1  ;;  %vm579_vm7 = vweird.f32 %v1086_v11 }
 0x361   :  { %617 = vst [vmem:[#allocation11] sm:$0xff] %v609_v21  ;;  %v584_v25 = vmul.f32 %v522_v23, %v1046_v6  ;;  %v525_v5 = vmul.f32 %v712_v15, %v524_v22  ;;  %717 = vrsqrt.f32 %v1090_v20  ;;  %vm559_vm11 = vweird.f32 %v1088_v40 }
 0x362   :  { %v546_v26 = vmul.f32 0.5, %v545_v4  ;;  %vm539_vm12 = vweird.f32 %v1090_v20 }
 0x363   :  { %v593_v27 = vmul.f32 %v1077_v56, %v584_v25  ;;  %v526_v30 = vmul.f32 0.5, %v525_v5  ;;  %v484_v31 = vpop.xlane.xlu0 %483 }
 0x364   :  { %v547_v32 = vsub.f32 1.5, %v546_v26  ;;  %v493_v34 = vmul.f32 0.03125, %v484_v31 }
 0x365   :  { %v714_v33 = vpop.eup %713  ;;  %v602_v35 = vadd.f32 %v1081_v57, %v593_v27  ;;  %v527_v36 = vsub.f32 1.5, %v526_v30 }
 0x366   :  { %v716_v37 = vpop.eup %715  ;;  %v548_v38 = vmul.f32 %v710_v0, %v547_v32  ;;  %v574_v6 = vmul.f32 %v714_v33, %v1086_v11  ;;  %v1100_v17 = vadd.f32 1e-05, %v493_v34  ;;  %vm580_vm6 = vweird.f32 %v714_v33 }
 0x367   :  { %v718_v19 = vpop.eup %717  ;;  %v610_v39 = vmax.f32 %v602_v35, 0.0  ;;  %v528_v41 = vmul.f32 %v712_v15, %v527_v36  ;;  %v554_v42 = vmul.f32 %v716_v37, %v1088_v40  ;;  %vm560_vm8 = vweird.f32 %v716_v37  ;;  %vm581_vm10 = vmor %vm579_vm7, %vm580_vm6 }
 0x368   :  { %v552_v44 = vsel %vm551_vm3, %v710_v0, %v548_v38  ;;  %v575_v45 = vmul.f32 %v714_v33, %v574_v6  ;;  %v534_v18 = vmul.f32 %v718_v19, %v1090_v20  ;;  %719 = vrsqrt.f32 %v1100_v17  ;;  %vm561_vm13 = vmor %vm559_vm11, %vm560_vm8 }
 0x369   :  { %618 = vst [vmem:[#allocation11 + $0x8] sm:$0xff] %v610_v39  ;;  %v587_v47 = vmul.f32 %v552_v44, %v1050_v13  ;;  %v532_v48 = vsel %vm531_vm5, %v712_v15, %v528_v41  ;;  %v555_v49 = vmul.f32 %v716_v37, %v554_v42  ;;  %vm540_vm9 = vweird.f32 %v718_v19 }
 0x36a   :  { %v585_v7 = vmul.f32 %v532_v48, %v1052_v14  ;;  %v576_v51 = vmul.f32 0.5, %v575_v45  ;;  %v535_v52 = vmul.f32 %v718_v19, %v534_v18  ;;  %vm541_vm14 = vmor %vm539_vm12, %vm540_vm9  ;;  %vm569_vm0 = vweird.f32 %v1100_v17 }
 0x36b   :  { %v596_v12 = vmul.f32 %v1077_v56, %v587_v47  ;;  %v556_v53 = vmul.f32 0.5, %v555_v49 }
 0x36c   :  { %v594_v54 = vmul.f32 %v1077_v56, %v585_v7  ;;  %v577_v55 = vsub.f32 1.5, %v576_v51  ;;  %v536_v59 = vmul.f32 0.5, %v535_v52 }
 0x36d   :  { %v605_v58 = vadd.f32 %v1081_v57, %v596_v12  ;;  %v557_v13 = vsub.f32 1.5, %v556_v53 }
 0x36e   :  { %v603_v60 = vadd.f32 %v1081_v57, %v594_v54  ;;  %v578_v61 = vmul.f32 %v714_v33, %v577_v55  ;;  %v537_v14 = vsub.f32 1.5, %v536_v59  ;;  %v720_v63 = vpop.eup %719 }
 0x36f   :  { %v613_v1 = vmax.f32 %v605_v58, 0.0  ;;  %v558_v2 = vmul.f32 %v716_v37, %v557_v13  ;;  %v564_v9 = vmul.f32 %v720_v63, %v1100_v17  ;;  %vm570_vm15 = vweird.f32 %v720_v63 }
 0x370   :  { %v611_v3 = vmax.f32 %v603_v60, 0.0  ;;  %v582_v8 = vsel %vm581_vm10, %v714_v33, %v578_v61  ;;  %v538_v43 = vmul.f32 %v718_v19, %v537_v14  ;;  %vm571_vm1 = vmor %vm569_vm0, %vm570_vm15 }
 0x371   :  { %621 = vst [vmem:[#allocation11 + $0x20] sm:$0xff] %v613_v1  ;;  %v590_v10 = vmul.f32 %v582_v8, %v1058_v28  ;;  %v562_v0 = vsel %vm561_vm13, %v716_v37, %v558_v2  ;;  %v565_v15 = vmul.f32 %v720_v63, %v564_v9 }
 0x372   :  { %619 = vst [vmem:[#allocation11 + $0x10] sm:$0xff] %v611_v3  ;;  %v588_v46 = vmul.f32 %v562_v0, %v1060_v29  ;;  %v542_v11 = vsel %vm541_vm14, %v718_v19, %v538_v43 }
 0x373   :  { %v599_v40 = vmul.f32 %v1077_v56, %v590_v10  ;;  %v586_v62 = vmul.f32 %v542_v11, %v1062_v24  ;;  %v566_v20 = vmul.f32 0.5, %v565_v15 }
 0x374   :  { %v597_v16 = vmul.f32 %v1077_v56, %v588_v46 }
 0x375   :  { %v608_v21 = vadd.f32 %v1081_v57, %v599_v40  ;;  %v595_v22 = vmul.f32 %v1077_v56, %v586_v62  ;;  %v567_v23 = vsub.f32 1.5, %v566_v20 }
 0x376   :  { %v606_v28 = vadd.f32 %v1081_v57, %v597_v16 }
 0x377   :  { %v616_v4 = vmax.f32 %v608_v21, 0.0  ;;  %v604_v29 = vadd.f32 %v1081_v57, %v595_v22  ;;  %v568_v5 = vmul.f32 %v720_v63, %v567_v23 }
 0x378   :  { %v614_v25 = vmax.f32 %v606_v28, 0.0 }
 0x379   :  { %624 = vst [vmem:[#allocation11 + $0x38] sm:$0xff] %v616_v4  ;;  %v612_v24 = vmax.f32 %v604_v29, 0.0  ;;  %v572_v26 = vsel %vm571_vm1, %v720_v63, %v568_v5 }
 0x37a   :  { %622 = vst [vmem:[#allocation11 + $0x28] sm:$0xff] %v614_v25  ;;  %v589_v27 = vmul.f32 %v572_v26, %v1070_v50 }
 0x37b   :  { %620 = vst [vmem:[#allocation11 + $0x18] sm:$0xff] %v612_v24 }
 0x37c   :  { %v598_v30 = vmul.f32 %v1077_v56, %v589_v27 }
 0x37e   :  { %v607_v31 = vadd.f32 %v1081_v57, %v598_v30 }
 0x380   :  { %v615_v32 = vmax.f32 %v607_v31, 0.0 }
 0x382   :  { %623 = vst [vmem:[#allocation11 + $0x30] sm:$0xff] %v615_v32 }
 0x383   :  { %637 = dma.vmem_to_hbm [thread:$0]  %s630_s4, 1024, %s632_s19, [#allocation4], %s874_s26, %s874_s26, %s875_s27  }
 0x384   :  { %871 = dma.done.wait [#allocation4], 1024  }
 0x385   :  { %872 = vsyncadd [#allocation4], 4294966272 }
 0x386   :  { %642 = vsyncpa [#allocation3], 1 }
 0x387   :  { %643 = vsyncpa [#allocation6], 1 }
 0x388   :  { %644 = vsyncpa [#allocation9], 1 }
 0x389   :  { %645 = vsyncpa [#allocation4], 1 }

</bundles_post_ra>
